<compile_context>
chip_gen: v6e
topology: v6e:2x2x1
jax: 0.10.0
libtpu: 0.0.40
codegen_flags: <defaults>
</compile_context>

<pallas_src>
import math
from functools import partial

import jax
import jax.numpy as jnp
from jax import lax
from jax.experimental import pallas as pl
from jax.experimental.pallas import tpu as pltpu

EPS = 1e-5


def _gelu_exact(x):
    # PyTorch nn.GELU() default: exact erf formulation.
    return 0.5 * x * (1.0 + lax.erf(x / math.sqrt(2.0)))


def _layernorm(x, w, b):
    mu = jnp.mean(x, axis=-1, keepdims=True)
    var = jnp.mean((x - mu) ** 2, axis=-1, keepdims=True)
    return (x - mu) * lax.rsqrt(var + EPS) * w + b


def encoder_kernel(
    x_ref,      # (S, E)  f32   input activations for this batch element
    wqkv_ref,   # (3, E, E) bf16  [wq, wk, wv], pre-transposed (in-dim, out-dim)
    wo_ref,     # (E, E)  bf16  out_proj weight, pre-transposed
    w1_ref,     # (E, F)  bf16  ffn linear1 weight, pre-transposed
    w2_ref,     # (F, E)  bf16  ffn linear2 weight, pre-transposed
    vec_ref,    # (10, W) f32   packed [bq,bk,bv,bo,b1,b2,ln1w,ln1b,ln2w,ln2b]
    o_ref,      # (S, E)  f32   output block == resident activation carry
    *,
    num_heads: int,
    ff_dim: int,
):
    l = pl.program_id(1)  # layer index (innermost, "arbitrary")

    @pl.when(l == 0)
    def _():
        # Output block index is constant across the layer axis -> stays
        # VMEM-resident; use it as the activation carry (no extra scratch).
        o_ref[...] = x_ref[...].astype(o_ref.dtype)

    x = o_ref[...].astype(jnp.float32)          # (S, E)
    S, E = x.shape
    H = num_heads
    Dh = E // H
    F = ff_dim

    wqkv = wqkv_ref[...]                        # (3, E, E) bf16
    wo = wo_ref[...]                            # (E, E)    bf16
    w1 = w1_ref[...]                            # (E, F)    bf16
    w2 = w2_ref[...]                            # (F, E)    bf16
    vecs = vec_ref[...]                         # (10, W)   f32
    bq, bk, bv = vecs[0, :E], vecs[1, :E], vecs[2, :E]
    bo = vecs[3, :E]
    b1 = vecs[4, :F]
    b2 = vecs[5, :E]
    ln1w, ln1b = vecs[6, :E], vecs[7, :E]
    ln2w, ln2b = vecs[8, :E], vecs[9, :E]

    # ---- Q/K/V projections: bf16 operands, f32 accumulation ----
    xb = x.astype(jnp.bfloat16)
    q = jnp.dot(xb, wqkv[0], preferred_element_type=jnp.float32) + bq   # (S, E)
    k = jnp.dot(xb, wqkv[1], preferred_element_type=jnp.float32) + bk
    v = jnp.dot(xb, wqkv[2], preferred_element_type=jnp.float32) + bv

    # ---- Multi-head self attention (dropout = identity in eval mode) ----
    scale = 1.0 / math.sqrt(Dh)
    attn = jnp.zeros((S, E), jnp.float32)
    for h in range(H):                          # static unroll over heads
        lo, hi = h * Dh, (h + 1) * Dh
        qh = q[:, lo:hi].astype(jnp.bfloat16)   # (S, Dh) contiguous tiles
        kh = k[:, lo:hi].astype(jnp.bfloat16)
        vh = v[:, lo:hi].astype(jnp.bfloat16)
        # q @ k^T without an explicit transpose (contract on dim 1 of both).
        s = lax.dot_general(qh, kh, (((1,), (1,)), ((), ())),
                            preferred_element_type=jnp.float32) * scale  # (S, S)
        s = s - jnp.max(s, axis=-1, keepdims=True)
        p = jnp.exp(s)
        p = p * pl.reciprocal(jnp.sum(p, axis=-1, keepdims=True), approx=False)
        ctx = jnp.dot(p.astype(jnp.bfloat16), vh,
                      preferred_element_type=jnp.float32)                # (S, Dh)
        # Fold this head's context straight into the output projection:
        # rows [lo:hi) of the (pre-transposed) wo belong to head h.
        attn = attn + jnp.dot(ctx.astype(jnp.bfloat16), wo[lo:hi, :],
                              preferred_element_type=jnp.float32)        # (S, E)
    attn = attn + bo

    h1 = _layernorm(x + attn, ln1w, ln1b)                                # (S, E)

    # ---- Feed-forward network ----
    f = jnp.dot(h1.astype(jnp.bfloat16), w1,
                preferred_element_type=jnp.float32) + b1                 # (S, F)
    f = _gelu_exact(f)
    ffn = jnp.dot(f.astype(jnp.bfloat16), w2,
                  preferred_element_type=jnp.float32) + b2               # (S, E)
    y = _layernorm(h1 + ffn, ln2w, ln2b)

    o_ref[...] = y.astype(o_ref.dtype)          # carry to next layer (VMEM only)


def _pack_params(layer_params, E, F):
    """Stack per-layer params: split+transpose weights (bf16), pack vectors."""
    W = max(E, F)

    def padded(v):
        v = v.reshape(-1).astype(jnp.float32)
        return jnp.pad(v, (0, W - v.shape[0]))

    wqkv3 = jnp.stack([
        jnp.stack([p["wqkv"][:E].T, p["wqkv"][E:2 * E].T, p["wqkv"][2 * E:].T])
        for p in layer_params]).astype(jnp.bfloat16)               # (L, 3, E, E)
    wo_t = jnp.stack([p["wo"].T for p in layer_params]).astype(jnp.bfloat16)
    w1_t = jnp.stack([p["w1"].T for p in layer_params]).astype(jnp.bfloat16)
    w2_t = jnp.stack([p["w2"].T for p in layer_params]).astype(jnp.bfloat16)
    vec = jnp.stack([
        jnp.stack([padded(p["bqkv"][:E]), padded(p["bqkv"][E:2 * E]),
                   padded(p["bqkv"][2 * E:]), padded(p["bo"]),
                   padded(p["b1"]), padded(p["b2"]),
                   padded(p["ln1w"]), padded(p["ln1b"]),
                   padded(p["ln2w"]), padded(p["ln2b"])])
        for p in layer_params])                                    # (L, 10, W)
    return wqkv3, wo_t, w1_t, w2_t, vec, W


def transformer_encoder(x, layer_params, num_heads):
    """x: (B, S, E). All layers of all batch elements in one pallas_call."""
    B, S, E = x.shape
    L = len(layer_params)
    F = layer_params[0]["w1"].shape[0]
    wqkv3, wo_t, w1_t, w2_t, vec, W = _pack_params(layer_params, E, F)

    kernel = partial(encoder_kernel, num_heads=num_heads, ff_dim=F)

    out = pl.pallas_call(
        kernel,
        out_shape=jax.ShapeDtypeStruct((B, S, E), x.dtype),
        grid_spec=pltpu.PrefetchScalarGridSpec(
            num_scalar_prefetch=0,
            # Batch axis outermost & parallel (megacore on v7x); layer axis
            # innermost & sequential (carries the resident activation state).
            grid=(B, L),
            in_specs=[
                pl.BlockSpec((None, S, E), lambda b, l: (b, 0, 0)),        # x
                pl.BlockSpec((None, 3, E, E), lambda b, l: (l, 0, 0, 0)),  # wq/wk/wv
                pl.BlockSpec((None, E, E), lambda b, l: (l, 0, 0)),        # wo
                pl.BlockSpec((None, E, F), lambda b, l: (l, 0, 0)),        # w1
                pl.BlockSpec((None, F, E), lambda b, l: (l, 0, 0)),        # w2
                pl.BlockSpec((None, 10, W), lambda b, l: (l, 0, 0)),       # vectors
            ],
            out_specs=pl.BlockSpec((None, S, E), lambda b, l: (b, 0, 0)),
        ),
        compiler_params=pltpu.CompilerParams(
            dimension_semantics=("parallel", "arbitrary"),
            vmem_limit_bytes=32 * 1024 * 1024,
        ),
    )(x, wqkv3, wo_t, w1_t, w2_t, vec)

    return out


def init_layer_params(key, embed_dim, ff_dim):
    ks = jax.random.split(key, 6)
    s = 0.02
    E, F = embed_dim, ff_dim
    return {
        "wqkv": s * jax.random.normal(ks[0], (3 * E, E), jnp.float32),
        "bqkv": jnp.zeros((3 * E,), jnp.float32),
        "wo":   s * jax.random.normal(ks[1], (E, E), jnp.float32),
        "bo":   jnp.zeros((E,), jnp.float32),
        "ln1w": jnp.ones((E,), jnp.float32),
        "ln1b": jnp.zeros((E,), jnp.float32),
        "w1":   s * jax.random.normal(ks[2], (F, E), jnp.float32),
        "b1":   jnp.zeros((F,), jnp.float32),
        "w2":   s * jax.random.normal(ks[3], (E, F), jnp.float32),
        "b2":   jnp.zeros((E,), jnp.float32),
        "ln2w": jnp.ones((E,), jnp.float32),
        "ln2b": jnp.zeros((E,), jnp.float32),
    }


def reference_encoder(x, layer_params, num_heads):
    """Pure-JAX f32 reference matching the PyTorch module in eval mode."""
    B, S, E = x.shape
    H = num_heads
    Dh = E // H

    def ln(z, w, b):
        mu = z.mean(-1, keepdims=True)
        var = ((z - mu) ** 2).mean(-1, keepdims=True)
        return (z - mu) / jnp.sqrt(var + EPS) * w + b

    for p in layer_params:
        wqkv, bqkv = p["wqkv"], p["bqkv"]
        q = x @ wqkv[:E].T + bqkv[:E]
        k = x @ wqkv[E:2 * E].T + bqkv[E:2 * E]
        v = x @ wqkv[2 * E:].T + bqkv[2 * E:]
        q = q.reshape(B, S, H, Dh)
        k = k.reshape(B, S, H, Dh)
        v = v.reshape(B, S, H, Dh)
        s = jnp.einsum("bqhd,bkhd->bhqk", q, k) / math.sqrt(Dh)
        a = jax.nn.softmax(s, axis=-1)
        ctx = jnp.einsum("bhqk,bkhd->bqhd", a, v).reshape(B, S, E)
        attn = ctx @ p["wo"].T + p["bo"]
        h = ln(x + attn, p["ln1w"], p["ln1b"])
        f = h @ p["w1"].T + p["b1"]
        f = 0.5 * f * (1.0 + lax.erf(f / math.sqrt(2.0)))
        ffn = f @ p["w2"].T + p["b2"]
        x = ln(h + ffn, p["ln2w"], p["ln2b"])
    return x


if __name__ == "__main__":
    # Small shapes: batch=2, seq=8, embed=32, heads=4, ff=64, layers=2.
    # (Functional-only sizes: every dim is below one (8,128) vreg tile; tiling /
    #  VMEM decisions must be re-validated at production E/F/S.)
    B, S, E, H, F, L = 2, 8, 32, 4, 64, 2

    key = jax.random.PRNGKey(0)
    key, xk = jax.random.split(key)
    x = jax.random.normal(xk, (B, S, E), jnp.float32)

    layer_keys = jax.random.split(key, L)
    layer_params = [init_layer_params(layer_keys[i], E, F) for i in range(L)]

    out = transformer_encoder(x, layer_params, num_heads=H)
    out = jax.block_until_ready(out)

    assert out.shape == (B, S, E)
    assert jnp.all(jnp.isfinite(out))

    ref = jax.block_until_ready(reference_encoder(x, layer_params, num_heads=H))
    # Tolerance accounts for bf16 matmul operands (f32 accumulation) in the kernel.
    assert jnp.allclose(out, ref, atol=2e-2, rtol=2e-2), (
        float(jnp.max(jnp.abs(out - ref))))

    print("KERNEL_OK")
</pallas_src>

<mosaic_0001>
module attributes {stable_mosaic.version = 11 : i64} {
  func.func @encoder_kernel(%arg0: i32, %arg1: i32, %arg2: memref<1x8x32xf32, #tpu.memory_space<vmem>>, %arg3: memref<1x3x32x32xbf16, #tpu.memory_space<vmem>>, %arg4: memref<1x32x32xbf16, #tpu.memory_space<vmem>>, %arg5: memref<1x32x64xbf16, #tpu.memory_space<vmem>>, %arg6: memref<1x64x32xbf16, #tpu.memory_space<vmem>>, %arg7: memref<1x10x64xf32, #tpu.memory_space<vmem>>, %arg8: memref<1x8x32xf32, #tpu.memory_space<vmem>>) attributes {dimension_semantics = [#tpu.dimension_semantics<parallel>, #tpu.dimension_semantics<arbitrary>], iteration_bounds = array<i64: 2, 2>, scalar_prefetch = 0 : i64, scratch_operands = 0 : i64, tpu.core_type = #tpu.core_type<tc>, window_params = [{transform_indices = @transform_0, window_bounds = array<i64: 1, 8, 32>}, {transform_indices = @transform_1, window_bounds = array<i64: 1, 3, 32, 32>}, {transform_indices = @transform_2, window_bounds = array<i64: 1, 32, 32>}, {transform_indices = @transform_3, window_bounds = array<i64: 1, 32, 64>}, {transform_indices = @transform_4, window_bounds = array<i64: 1, 64, 32>}, {transform_indices = @transform_5, window_bounds = array<i64: 1, 10, 64>}, {transform_indices = @transform_6, window_bounds = array<i64: 1, 8, 32>}]} {
    %c0_i32 = arith.constant 0 : i32
    %0 = arith.cmpi eq, %arg1, %c0_i32 : i32
    %1 = arith.extui %0 : i1 to i32
    %c0_i32_0 = arith.constant 0 : i32
    %2 = arith.cmpi ne, %1, %c0_i32_0 : i32
    scf.if %2 {
      %c0_64 = arith.constant 0 : index
      %c0_65 = arith.constant 0 : index
      %c0_66 = arith.constant 0 : index
      %229 = vector.load %arg2[%c0_64, %c0_65, %c0_66] : memref<1x8x32xf32, #tpu.memory_space<vmem>>, vector<1x8x32xf32>
      %230 = vector.shape_cast %229 : vector<1x8x32xf32> to vector<8x32xf32>
      %c0_67 = arith.constant 0 : index
      %c0_68 = arith.constant 0 : index
      %c0_69 = arith.constant 0 : index
      %231 = vector.load %arg8[%c0_67, %c0_68, %c0_69] : memref<1x8x32xf32, #tpu.memory_space<vmem>>, vector<1x8x32xf32>
      %232 = vector.shape_cast %231 : vector<1x8x32xf32> to vector<8x32xf32>
      %233 = vector.shape_cast %230 : vector<8x32xf32> to vector<1x8x32xf32>
      tpu.vector_store %arg8[%c0_67, %c0_68, %c0_69], %233 {strides = array<i32>} : memref<1x8x32xf32, #tpu.memory_space<vmem>>, vector<1x8x32xf32>,
    } else {
    }
    %c0 = arith.constant 0 : index
    %c0_1 = arith.constant 0 : index
    %c0_2 = arith.constant 0 : index
    %3 = vector.load %arg8[%c0, %c0_1, %c0_2] : memref<1x8x32xf32, #tpu.memory_space<vmem>>, vector<1x8x32xf32>
    %4 = vector.shape_cast %3 : vector<1x8x32xf32> to vector<8x32xf32>
    %c0_3 = arith.constant 0 : index
    %c0_4 = arith.constant 0 : index
    %c0_5 = arith.constant 0 : index
    %c0_6 = arith.constant 0 : index
    %5 = vector.load %arg3[%c0_3, %c0_4, %c0_5, %c0_6] : memref<1x3x32x32xbf16, #tpu.memory_space<vmem>>, vector<1x3x32x32xbf16>
    %6 = vector.shape_cast %5 : vector<1x3x32x32xbf16> to vector<3x32x32xbf16>
    %c0_7 = arith.constant 0 : index
    %c0_8 = arith.constant 0 : index
    %c0_9 = arith.constant 0 : index
    %7 = vector.load %arg4[%c0_7, %c0_8, %c0_9] : memref<1x32x32xbf16, #tpu.memory_space<vmem>>, vector<1x32x32xbf16>
    %8 = vector.shape_cast %7 : vector<1x32x32xbf16> to vector<32x32xbf16>
    %c0_10 = arith.constant 0 : index
    %c0_11 = arith.constant 0 : index
    %c0_12 = arith.constant 0 : index
    %9 = vector.load %arg5[%c0_10, %c0_11, %c0_12] : memref<1x32x64xbf16, #tpu.memory_space<vmem>>, vector<1x32x64xbf16>
    %10 = vector.shape_cast %9 : vector<1x32x64xbf16> to vector<32x64xbf16>
    %c0_13 = arith.constant 0 : index
    %c0_14 = arith.constant 0 : index
    %c0_15 = arith.constant 0 : index
    %11 = vector.load %arg6[%c0_13, %c0_14, %c0_15] : memref<1x64x32xbf16, #tpu.memory_space<vmem>>, vector<1x64x32xbf16>
    %12 = vector.shape_cast %11 : vector<1x64x32xbf16> to vector<64x32xbf16>
    %c0_16 = arith.constant 0 : index
    %c0_17 = arith.constant 0 : index
    %c0_18 = arith.constant 0 : index
    %13 = vector.load %arg7[%c0_16, %c0_17, %c0_18] : memref<1x10x64xf32, #tpu.memory_space<vmem>>, vector<1x10x64xf32>
    %14 = vector.shape_cast %13 : vector<1x10x64xf32> to vector<10x64xf32>
    %15 = vector.extract_strided_slice %14 {offsets = [0, 0], sizes = [1, 32], strides = [1, 1]} : vector<10x64xf32> to vector<1x32xf32>
    %16 = vector.shape_cast %15 : vector<1x32xf32> to vector<32xf32>
    %17 = vector.extract_strided_slice %14 {offsets = [1, 0], sizes = [1, 32], strides = [1, 1]} : vector<10x64xf32> to vector<1x32xf32>
    %18 = vector.shape_cast %17 : vector<1x32xf32> to vector<32xf32>
    %19 = vector.extract_strided_slice %14 {offsets = [2, 0], sizes = [1, 32], strides = [1, 1]} : vector<10x64xf32> to vector<1x32xf32>
    %20 = vector.shape_cast %19 : vector<1x32xf32> to vector<32xf32>
    %21 = vector.extract_strided_slice %14 {offsets = [3, 0], sizes = [1, 32], strides = [1, 1]} : vector<10x64xf32> to vector<1x32xf32>
    %22 = vector.shape_cast %21 : vector<1x32xf32> to vector<32xf32>
    %23 = vector.extract_strided_slice %14 {offsets = [4, 0], sizes = [1, 64], strides = [1, 1]} : vector<10x64xf32> to vector<1x64xf32>
    %24 = vector.shape_cast %23 : vector<1x64xf32> to vector<64xf32>
    %25 = vector.extract_strided_slice %14 {offsets = [5, 0], sizes = [1, 32], strides = [1, 1]} : vector<10x64xf32> to vector<1x32xf32>
    %26 = vector.shape_cast %25 : vector<1x32xf32> to vector<32xf32>
    %27 = vector.extract_strided_slice %14 {offsets = [6, 0], sizes = [1, 32], strides = [1, 1]} : vector<10x64xf32> to vector<1x32xf32>
    %28 = vector.shape_cast %27 : vector<1x32xf32> to vector<32xf32>
    %29 = vector.extract_strided_slice %14 {offsets = [7, 0], sizes = [1, 32], strides = [1, 1]} : vector<10x64xf32> to vector<1x32xf32>
    %30 = vector.shape_cast %29 : vector<1x32xf32> to vector<32xf32>
    %31 = vector.extract_strided_slice %14 {offsets = [8, 0], sizes = [1, 32], strides = [1, 1]} : vector<10x64xf32> to vector<1x32xf32>
    %32 = vector.shape_cast %31 : vector<1x32xf32> to vector<32xf32>
    %33 = vector.extract_strided_slice %14 {offsets = [9, 0], sizes = [1, 32], strides = [1, 1]} : vector<10x64xf32> to vector<1x32xf32>
    %34 = vector.shape_cast %33 : vector<1x32xf32> to vector<32xf32>
    %35 = arith.truncf %4 : vector<8x32xf32> to vector<8x32xbf16>
    %36 = vector.extract_strided_slice %6 {offsets = [0, 0, 0], sizes = [1, 32, 32], strides = [1, 1, 1]} : vector<3x32x32xbf16> to vector<1x32x32xbf16>
    %37 = vector.shape_cast %36 : vector<1x32x32xbf16> to vector<32x32xbf16>
    %cst = arith.constant dense<0.000000e+00> : vector<8x32xf32>
    %38 = tpu.matmul %35, %37, %cst {dimension_numbers = #tpu.dot_dimension_numbers<[1], [0], [0], [1], [0, 0, 1, 1], [], []>} : vector<8x32xbf16>, vector<32x32xbf16>, vector<8x32xf32> -> vector<8x32xf32>
    %39 = vector.shape_cast %16 : vector<32xf32> to vector<1x32xf32>
    %40 = vector.broadcast %39 : vector<1x32xf32> to vector<8x32xf32>
    %41 = arith.addf %38, %40 : vector<8x32xf32>
    %42 = vector.extract_strided_slice %6 {offsets = [1, 0, 0], sizes = [1, 32, 32], strides = [1, 1, 1]} : vector<3x32x32xbf16> to vector<1x32x32xbf16>
    %43 = vector.shape_cast %42 : vector<1x32x32xbf16> to vector<32x32xbf16>
    %cst_19 = arith.constant dense<0.000000e+00> : vector<8x32xf32>
    %44 = tpu.matmul %35, %43, %cst_19 {dimension_numbers = #tpu.dot_dimension_numbers<[1], [0], [0], [1], [0, 0, 1, 1], [], []>} : vector<8x32xbf16>, vector<32x32xbf16>, vector<8x32xf32> -> vector<8x32xf32>
    %45 = vector.shape_cast %18 : vector<32xf32> to vector<1x32xf32>
    %46 = vector.broadcast %45 : vector<1x32xf32> to vector<8x32xf32>
    %47 = arith.addf %44, %46 : vector<8x32xf32>
    %48 = vector.extract_strided_slice %6 {offsets = [2, 0, 0], sizes = [1, 32, 32], strides = [1, 1, 1]} : vector<3x32x32xbf16> to vector<1x32x32xbf16>
    %49 = vector.shape_cast %48 : vector<1x32x32xbf16> to vector<32x32xbf16>
    %cst_20 = arith.constant dense<0.000000e+00> : vector<8x32xf32>
    %50 = tpu.matmul %35, %49, %cst_20 {dimension_numbers = #tpu.dot_dimension_numbers<[1], [0], [0], [1], [0, 0, 1, 1], [], []>} : vector<8x32xbf16>, vector<32x32xbf16>, vector<8x32xf32> -> vector<8x32xf32>
    %51 = vector.shape_cast %20 : vector<32xf32> to vector<1x32xf32>
    %52 = vector.broadcast %51 : vector<1x32xf32> to vector<8x32xf32>
    %53 = arith.addf %50, %52 : vector<8x32xf32>
    %cst_21 = arith.constant 0.000000e+00 : f32
    %54 = vector.broadcast %cst_21 : f32 to vector<8x32xf32>
    %55 = vector.extract_strided_slice %41 {offsets = [0, 0], sizes = [8, 8], strides = [1, 1]} : vector<8x32xf32> to vector<8x8xf32>
    %56 = arith.truncf %55 : vector<8x8xf32> to vector<8x8xbf16>
    %57 = vector.extract_strided_slice %47 {offsets = [0, 0], sizes = [8, 8], strides = [1, 1]} : vector<8x32xf32> to vector<8x8xf32>
    %58 = arith.truncf %57 : vector<8x8xf32> to vector<8x8xbf16>
    %59 = vector.extract_strided_slice %53 {offsets = [0, 0], sizes = [8, 8], strides = [1, 1]} : vector<8x32xf32> to vector<8x8xf32>
    %60 = arith.truncf %59 : vector<8x8xf32> to vector<8x8xbf16>
    %cst_22 = arith.constant dense<0.000000e+00> : vector<8x8xf32>
    %61 = tpu.matmul %56, %58, %cst_22 {dimension_numbers = #tpu.dot_dimension_numbers<[1], [1], [0], [0], [0, 0, 1, 0], [], []>} : vector<8x8xbf16>, vector<8x8xbf16>, vector<8x8xf32> -> vector<8x8xf32>
    %cst_23 = arith.constant 0.353553385 : f32
    %62 = vector.broadcast %cst_23 : f32 to vector<8x8xf32>
    %63 = arith.mulf %61, %62 : vector<8x8xf32>
    %cst_24 = arith.constant dense<0xFF800000> : vector<8xf32>
    %64 = vector.multi_reduction <maximumf>, %63, %cst_24 [1] : vector<8x8xf32> to vector<8xf32>
    %65 = vector.shape_cast %64 : vector<8xf32> to vector<8x1xf32>
    %66 = vector.broadcast %65 : vector<8x1xf32> to vector<8x8xf32>
    %67 = arith.subf %63, %66 : vector<8x8xf32>
    %68 = math.exp %67 : vector<8x8xf32>
    %cst_25 = arith.constant dense<0.000000e+00> : vector<8xf32>
    %69 = vector.multi_reduction <add>, %68, %cst_25 [1] : vector<8x8xf32> to vector<8xf32>
    %70 = vector.shape_cast %69 : vector<8xf32> to vector<8x1xf32>
    %71 = tpu.reciprocal %70 : vector<8x1xf32> -> vector<8x1xf32>
    %72 = vector.broadcast %71 : vector<8x1xf32> to vector<8x8xf32>
    %73 = arith.mulf %68, %72 : vector<8x8xf32>
    %74 = arith.truncf %73 : vector<8x8xf32> to vector<8x8xbf16>
    %cst_26 = arith.constant dense<0.000000e+00> : vector<8x8xf32>
    %75 = tpu.matmul %74, %60, %cst_26 {dimension_numbers = #tpu.dot_dimension_numbers<[1], [0], [0], [1], [0, 0, 1, 1], [], []>} : vector<8x8xbf16>, vector<8x8xbf16>, vector<8x8xf32> -> vector<8x8xf32>
    %76 = arith.truncf %75 : vector<8x8xf32> to vector<8x8xbf16>
    %77 = vector.extract_strided_slice %8 {offsets = [0, 0], sizes = [8, 32], strides = [1, 1]} : vector<32x32xbf16> to vector<8x32xbf16>
    %cst_27 = arith.constant dense<0.000000e+00> : vector<8x32xf32>
    %78 = tpu.matmul %76, %77, %cst_27 {dimension_numbers = #tpu.dot_dimension_numbers<[1], [0], [0], [1], [0, 0, 1, 1], [], []>} : vector<8x8xbf16>, vector<8x32xbf16>, vector<8x32xf32> -> vector<8x32xf32>
    %79 = arith.addf %54, %78 : vector<8x32xf32>
    %80 = vector.extract_strided_slice %41 {offsets = [0, 8], sizes = [8, 8], strides = [1, 1]} : vector<8x32xf32> to vector<8x8xf32>
    %81 = arith.truncf %80 : vector<8x8xf32> to vector<8x8xbf16>
    %82 = vector.extract_strided_slice %47 {offsets = [0, 8], sizes = [8, 8], strides = [1, 1]} : vector<8x32xf32> to vector<8x8xf32>
    %83 = arith.truncf %82 : vector<8x8xf32> to vector<8x8xbf16>
    %84 = vector.extract_strided_slice %53 {offsets = [0, 8], sizes = [8, 8], strides = [1, 1]} : vector<8x32xf32> to vector<8x8xf32>
    %85 = arith.truncf %84 : vector<8x8xf32> to vector<8x8xbf16>
    %cst_28 = arith.constant dense<0.000000e+00> : vector<8x8xf32>
    %86 = tpu.matmul %81, %83, %cst_28 {dimension_numbers = #tpu.dot_dimension_numbers<[1], [1], [0], [0], [0, 0, 1, 0], [], []>} : vector<8x8xbf16>, vector<8x8xbf16>, vector<8x8xf32> -> vector<8x8xf32>
    %cst_29 = arith.constant 0.353553385 : f32
    %87 = vector.broadcast %cst_29 : f32 to vector<8x8xf32>
    %88 = arith.mulf %86, %87 : vector<8x8xf32>
    %cst_30 = arith.constant dense<0xFF800000> : vector<8xf32>
    %89 = vector.multi_reduction <maximumf>, %88, %cst_30 [1] : vector<8x8xf32> to vector<8xf32>
    %90 = vector.shape_cast %89 : vector<8xf32> to vector<8x1xf32>
    %91 = vector.broadcast %90 : vector<8x1xf32> to vector<8x8xf32>
    %92 = arith.subf %88, %91 : vector<8x8xf32>
    %93 = math.exp %92 : vector<8x8xf32>
    %cst_31 = arith.constant dense<0.000000e+00> : vector<8xf32>
    %94 = vector.multi_reduction <add>, %93, %cst_31 [1] : vector<8x8xf32> to vector<8xf32>
    %95 = vector.shape_cast %94 : vector<8xf32> to vector<8x1xf32>
    %96 = tpu.reciprocal %95 : vector<8x1xf32> -> vector<8x1xf32>
    %97 = vector.broadcast %96 : vector<8x1xf32> to vector<8x8xf32>
    %98 = arith.mulf %93, %97 : vector<8x8xf32>
    %99 = arith.truncf %98 : vector<8x8xf32> to vector<8x8xbf16>
    %cst_32 = arith.constant dense<0.000000e+00> : vector<8x8xf32>
    %100 = tpu.matmul %99, %85, %cst_32 {dimension_numbers = #tpu.dot_dimension_numbers<[1], [0], [0], [1], [0, 0, 1, 1], [], []>} : vector<8x8xbf16>, vector<8x8xbf16>, vector<8x8xf32> -> vector<8x8xf32>
    %101 = arith.truncf %100 : vector<8x8xf32> to vector<8x8xbf16>
    %102 = vector.extract_strided_slice %8 {offsets = [8, 0], sizes = [8, 32], strides = [1, 1]} : vector<32x32xbf16> to vector<8x32xbf16>
    %cst_33 = arith.constant dense<0.000000e+00> : vector<8x32xf32>
    %103 = tpu.matmul %101, %102, %cst_33 {dimension_numbers = #tpu.dot_dimension_numbers<[1], [0], [0], [1], [0, 0, 1, 1], [], []>} : vector<8x8xbf16>, vector<8x32xbf16>, vector<8x32xf32> -> vector<8x32xf32>
    %104 = arith.addf %79, %103 : vector<8x32xf32>
    %105 = vector.extract_strided_slice %41 {offsets = [0, 16], sizes = [8, 8], strides = [1, 1]} : vector<8x32xf32> to vector<8x8xf32>
    %106 = arith.truncf %105 : vector<8x8xf32> to vector<8x8xbf16>
    %107 = vector.extract_strided_slice %47 {offsets = [0, 16], sizes = [8, 8], strides = [1, 1]} : vector<8x32xf32> to vector<8x8xf32>
    %108 = arith.truncf %107 : vector<8x8xf32> to vector<8x8xbf16>
    %109 = vector.extract_strided_slice %53 {offsets = [0, 16], sizes = [8, 8], strides = [1, 1]} : vector<8x32xf32> to vector<8x8xf32>
    %110 = arith.truncf %109 : vector<8x8xf32> to vector<8x8xbf16>
    %cst_34 = arith.constant dense<0.000000e+00> : vector<8x8xf32>
    %111 = tpu.matmul %106, %108, %cst_34 {dimension_numbers = #tpu.dot_dimension_numbers<[1], [1], [0], [0], [0, 0, 1, 0], [], []>} : vector<8x8xbf16>, vector<8x8xbf16>, vector<8x8xf32> -> vector<8x8xf32>
    %cst_35 = arith.constant 0.353553385 : f32
    %112 = vector.broadcast %cst_35 : f32 to vector<8x8xf32>
    %113 = arith.mulf %111, %112 : vector<8x8xf32>
    %cst_36 = arith.constant dense<0xFF800000> : vector<8xf32>
    %114 = vector.multi_reduction <maximumf>, %113, %cst_36 [1] : vector<8x8xf32> to vector<8xf32>
    %115 = vector.shape_cast %114 : vector<8xf32> to vector<8x1xf32>
    %116 = vector.broadcast %115 : vector<8x1xf32> to vector<8x8xf32>
    %117 = arith.subf %113, %116 : vector<8x8xf32>
    %118 = math.exp %117 : vector<8x8xf32>
    %cst_37 = arith.constant dense<0.000000e+00> : vector<8xf32>
    %119 = vector.multi_reduction <add>, %118, %cst_37 [1] : vector<8x8xf32> to vector<8xf32>
    %120 = vector.shape_cast %119 : vector<8xf32> to vector<8x1xf32>
    %121 = tpu.reciprocal %120 : vector<8x1xf32> -> vector<8x1xf32>
    %122 = vector.broadcast %121 : vector<8x1xf32> to vector<8x8xf32>
    %123 = arith.mulf %118, %122 : vector<8x8xf32>
    %124 = arith.truncf %123 : vector<8x8xf32> to vector<8x8xbf16>
    %cst_38 = arith.constant dense<0.000000e+00> : vector<8x8xf32>
    %125 = tpu.matmul %124, %110, %cst_38 {dimension_numbers = #tpu.dot_dimension_numbers<[1], [0], [0], [1], [0, 0, 1, 1], [], []>} : vector<8x8xbf16>, vector<8x8xbf16>, vector<8x8xf32> -> vector<8x8xf32>
    %126 = arith.truncf %125 : vector<8x8xf32> to vector<8x8xbf16>
    %127 = vector.extract_strided_slice %8 {offsets = [16, 0], sizes = [8, 32], strides = [1, 1]} : vector<32x32xbf16> to vector<8x32xbf16>
    %cst_39 = arith.constant dense<0.000000e+00> : vector<8x32xf32>
    %128 = tpu.matmul %126, %127, %cst_39 {dimension_numbers = #tpu.dot_dimension_numbers<[1], [0], [0], [1], [0, 0, 1, 1], [], []>} : vector<8x8xbf16>, vector<8x32xbf16>, vector<8x32xf32> -> vector<8x32xf32>
    %129 = arith.addf %104, %128 : vector<8x32xf32>
    %130 = vector.extract_strided_slice %41 {offsets = [0, 24], sizes = [8, 8], strides = [1, 1]} : vector<8x32xf32> to vector<8x8xf32>
    %131 = arith.truncf %130 : vector<8x8xf32> to vector<8x8xbf16>
    %132 = vector.extract_strided_slice %47 {offsets = [0, 24], sizes = [8, 8], strides = [1, 1]} : vector<8x32xf32> to vector<8x8xf32>
    %133 = arith.truncf %132 : vector<8x8xf32> to vector<8x8xbf16>
    %134 = vector.extract_strided_slice %53 {offsets = [0, 24], sizes = [8, 8], strides = [1, 1]} : vector<8x32xf32> to vector<8x8xf32>
    %135 = arith.truncf %134 : vector<8x8xf32> to vector<8x8xbf16>
    %cst_40 = arith.constant dense<0.000000e+00> : vector<8x8xf32>
    %136 = tpu.matmul %131, %133, %cst_40 {dimension_numbers = #tpu.dot_dimension_numbers<[1], [1], [0], [0], [0, 0, 1, 0], [], []>} : vector<8x8xbf16>, vector<8x8xbf16>, vector<8x8xf32> -> vector<8x8xf32>
    %cst_41 = arith.constant 0.353553385 : f32
    %137 = vector.broadcast %cst_41 : f32 to vector<8x8xf32>
    %138 = arith.mulf %136, %137 : vector<8x8xf32>
    %cst_42 = arith.constant dense<0xFF800000> : vector<8xf32>
    %139 = vector.multi_reduction <maximumf>, %138, %cst_42 [1] : vector<8x8xf32> to vector<8xf32>
    %140 = vector.shape_cast %139 : vector<8xf32> to vector<8x1xf32>
    %141 = vector.broadcast %140 : vector<8x1xf32> to vector<8x8xf32>
    %142 = arith.subf %138, %141 : vector<8x8xf32>
    %143 = math.exp %142 : vector<8x8xf32>
    %cst_43 = arith.constant dense<0.000000e+00> : vector<8xf32>
    %144 = vector.multi_reduction <add>, %143, %cst_43 [1] : vector<8x8xf32> to vector<8xf32>
    %145 = vector.shape_cast %144 : vector<8xf32> to vector<8x1xf32>
    %146 = tpu.reciprocal %145 : vector<8x1xf32> -> vector<8x1xf32>
    %147 = vector.broadcast %146 : vector<8x1xf32> to vector<8x8xf32>
    %148 = arith.mulf %143, %147 : vector<8x8xf32>
    %149 = arith.truncf %148 : vector<8x8xf32> to vector<8x8xbf16>
    %cst_44 = arith.constant dense<0.000000e+00> : vector<8x8xf32>
    %150 = tpu.matmul %149, %135, %cst_44 {dimension_numbers = #tpu.dot_dimension_numbers<[1], [0], [0], [1], [0, 0, 1, 1], [], []>} : vector<8x8xbf16>, vector<8x8xbf16>, vector<8x8xf32> -> vector<8x8xf32>
    %151 = arith.truncf %150 : vector<8x8xf32> to vector<8x8xbf16>
    %152 = vector.extract_strided_slice %8 {offsets = [24, 0], sizes = [8, 32], strides = [1, 1]} : vector<32x32xbf16> to vector<8x32xbf16>
    %cst_45 = arith.constant dense<0.000000e+00> : vector<8x32xf32>
    %153 = tpu.matmul %151, %152, %cst_45 {dimension_numbers = #tpu.dot_dimension_numbers<[1], [0], [0], [1], [0, 0, 1, 1], [], []>} : vector<8x8xbf16>, vector<8x32xbf16>, vector<8x32xf32> -> vector<8x32xf32>
    %154 = arith.addf %129, %153 : vector<8x32xf32>
    %155 = vector.shape_cast %22 : vector<32xf32> to vector<1x32xf32>
    %156 = vector.broadcast %155 : vector<1x32xf32> to vector<8x32xf32>
    %157 = arith.addf %154, %156 : vector<8x32xf32>
    %158 = arith.addf %4, %157 : vector<8x32xf32>
    %cst_46 = arith.constant dense<0.000000e+00> : vector<8xf32>
    %159 = vector.multi_reduction <add>, %158, %cst_46 [1] : vector<8x32xf32> to vector<8xf32>
    %160 = vector.shape_cast %159 : vector<8xf32> to vector<8x1xf32>
    %cst_47 = arith.constant 3.200000e+01 : f32
    %161 = vector.broadcast %cst_47 : f32 to vector<8x1xf32>
    %162 = arith.divf %160, %161 : vector<8x1xf32>
    %163 = vector.broadcast %162 : vector<8x1xf32> to vector<8x32xf32>
    %164 = arith.subf %158, %163 : vector<8x32xf32>
    %165 = arith.mulf %164, %164 : vector<8x32xf32>
    %cst_48 = arith.constant dense<0.000000e+00> : vector<8xf32>
    %166 = vector.multi_reduction <add>, %165, %cst_48 [1] : vector<8x32xf32> to vector<8xf32>
    %167 = vector.shape_cast %166 : vector<8xf32> to vector<8x1xf32>
    %cst_49 = arith.constant 3.200000e+01 : f32
    %168 = vector.broadcast %cst_49 : f32 to vector<8x1xf32>
    %169 = arith.divf %167, %168 : vector<8x1xf32>
    %170 = vector.broadcast %162 : vector<8x1xf32> to vector<8x32xf32>
    %171 = arith.subf %158, %170 : vector<8x32xf32>
    %cst_50 = arith.constant 9.99999974E-6 : f32
    %172 = vector.broadcast %cst_50 : f32 to vector<8x1xf32>
    %173 = arith.addf %169, %172 : vector<8x1xf32>
    %174 = math.rsqrt %173 : vector<8x1xf32>
    %175 = vector.broadcast %174 : vector<8x1xf32> to vector<8x32xf32>
    %176 = arith.mulf %171, %175 : vector<8x32xf32>
    %177 = vector.shape_cast %28 : vector<32xf32> to vector<1x32xf32>
    %178 = vector.broadcast %177 : vector<1x32xf32> to vector<8x32xf32>
    %179 = arith.mulf %176, %178 : vector<8x32xf32>
    %180 = vector.shape_cast %30 : vector<32xf32> to vector<1x32xf32>
    %181 = vector.broadcast %180 : vector<1x32xf32> to vector<8x32xf32>
    %182 = arith.addf %179, %181 : vector<8x32xf32>
    %183 = arith.truncf %182 : vector<8x32xf32> to vector<8x32xbf16>
    %cst_51 = arith.constant dense<0.000000e+00> : vector<8x64xf32>
    %184 = tpu.matmul %183, %10, %cst_51 {dimension_numbers = #tpu.dot_dimension_numbers<[1], [0], [0], [1], [0, 0, 1, 1], [], []>} : vector<8x32xbf16>, vector<32x64xbf16>, vector<8x64xf32> -> vector<8x64xf32>
    %185 = vector.shape_cast %24 : vector<64xf32> to vector<1x64xf32>
    %186 = vector.broadcast %185 : vector<1x64xf32> to vector<8x64xf32>
    %187 = arith.addf %184, %186 : vector<8x64xf32>
    %cst_52 = arith.constant 5.000000e-01 : f32
    %188 = vector.broadcast %cst_52 : f32 to vector<8x64xf32>
    %189 = arith.mulf %188, %187 : vector<8x64xf32>
    %cst_53 = arith.constant 1.41421354 : f32
    %190 = vector.broadcast %cst_53 : f32 to vector<8x64xf32>
    %191 = arith.divf %187, %190 : vector<8x64xf32>
    %192 = math.erf %191 : vector<8x64xf32>
    %cst_54 = arith.constant 1.000000e+00 : f32
    %193 = vector.broadcast %cst_54 : f32 to vector<8x64xf32>
    %194 = arith.addf %193, %192 : vector<8x64xf32>
    %195 = arith.mulf %189, %194 : vector<8x64xf32>
    %196 = arith.truncf %195 : vector<8x64xf32> to vector<8x64xbf16>
    %cst_55 = arith.constant dense<0.000000e+00> : vector<8x32xf32>
    %197 = tpu.matmul %196, %12, %cst_55 {dimension_numbers = #tpu.dot_dimension_numbers<[1], [0], [0], [1], [0, 0, 1, 1], [], []>} : vector<8x64xbf16>, vector<64x32xbf16>, vector<8x32xf32> -> vector<8x32xf32>
    %198 = vector.shape_cast %26 : vector<32xf32> to vector<1x32xf32>
    %199 = vector.broadcast %198 : vector<1x32xf32> to vector<8x32xf32>
    %200 = arith.addf %197, %199 : vector<8x32xf32>
    %201 = arith.addf %182, %200 : vector<8x32xf32>
    %cst_56 = arith.constant dense<0.000000e+00> : vector<8xf32>
    %202 = vector.multi_reduction <add>, %201, %cst_56 [1] : vector<8x32xf32> to vector<8xf32>
    %203 = vector.shape_cast %202 : vector<8xf32> to vector<8x1xf32>
    %cst_57 = arith.constant 3.200000e+01 : f32
    %204 = vector.broadcast %cst_57 : f32 to vector<8x1xf32>
    %205 = arith.divf %203, %204 : vector<8x1xf32>
    %206 = vector.broadcast %205 : vector<8x1xf32> to vector<8x32xf32>
    %207 = arith.subf %201, %206 : vector<8x32xf32>
    %208 = arith.mulf %207, %207 : vector<8x32xf32>
    %cst_58 = arith.constant dense<0.000000e+00> : vector<8xf32>
    %209 = vector.multi_reduction <add>, %208, %cst_58 [1] : vector<8x32xf32> to vector<8xf32>
    %210 = vector.shape_cast %209 : vector<8xf32> to vector<8x1xf32>
    %cst_59 = arith.constant 3.200000e+01 : f32
    %211 = vector.broadcast %cst_59 : f32 to vector<8x1xf32>
    %212 = arith.divf %210, %211 : vector<8x1xf32>
    %213 = vector.broadcast %205 : vector<8x1xf32> to vector<8x32xf32>
    %214 = arith.subf %201, %213 : vector<8x32xf32>
    %cst_60 = arith.constant 9.99999974E-6 : f32
    %215 = vector.broadcast %cst_60 : f32 to vector<8x1xf32>
    %216 = arith.addf %212, %215 : vector<8x1xf32>
    %217 = math.rsqrt %216 : vector<8x1xf32>
    %218 = vector.broadcast %217 : vector<8x1xf32> to vector<8x32xf32>
    %219 = arith.mulf %214, %218 : vector<8x32xf32>
    %220 = vector.shape_cast %32 : vector<32xf32> to vector<1x32xf32>
    %221 = vector.broadcast %220 : vector<1x32xf32> to vector<8x32xf32>
    %222 = arith.mulf %219, %221 : vector<8x32xf32>
    %223 = vector.shape_cast %34 : vector<32xf32> to vector<1x32xf32>
    %224 = vector.broadcast %223 : vector<1x32xf32> to vector<8x32xf32>
    %225 = arith.addf %222, %224 : vector<8x32xf32>
    %c0_61 = arith.constant 0 : index
    %c0_62 = arith.constant 0 : index
    %c0_63 = arith.constant 0 : index
    %226 = vector.load %arg8[%c0_61, %c0_62, %c0_63] : memref<1x8x32xf32, #tpu.memory_space<vmem>>, vector<1x8x32xf32>
    %227 = vector.shape_cast %226 : vector<1x8x32xf32> to vector<8x32xf32>
    %228 = vector.shape_cast %225 : vector<8x32xf32> to vector<1x8x32xf32>
    tpu.vector_store %arg8[%c0_61, %c0_62, %c0_63], %228 {strides = array<i32>} : memref<1x8x32xf32, #tpu.memory_space<vmem>>, vector<1x8x32xf32>,
    return
  }
  func.func @transform_0(%arg0: i32, %arg1: i32) -> (i32, i32, i32) {
    %c0_i32 = arith.constant 0 : i32
    %c0_i32_0 = arith.constant 0 : i32
    %c0_i32_1 = arith.constant 0 : i32
    return %arg0, %c0_i32, %c0_i32_0 : i32, i32, i32
  }
  func.func @transform_1(%arg0: i32, %arg1: i32) -> (i32, i32, i32, i32) {
    %c0_i32 = arith.constant 0 : i32
    %c0_i32_0 = arith.constant 0 : i32
    %c0_i32_1 = arith.constant 0 : i32
    %c0_i32_2 = arith.constant 0 : i32
    return %arg1, %c0_i32, %c0_i32_0, %c0_i32_1 : i32, i32, i32, i32
  }
  func.func @transform_2(%arg0: i32, %arg1: i32) -> (i32, i32, i32) {
    %c0_i32 = arith.constant 0 : i32
    %c0_i32_0 = arith.constant 0 : i32
    %c0_i32_1 = arith.constant 0 : i32
    return %arg1, %c0_i32, %c0_i32_0 : i32, i32, i32
  }
  func.func @transform_3(%arg0: i32, %arg1: i32) -> (i32, i32, i32) {
    %c0_i32 = arith.constant 0 : i32
    %c0_i32_0 = arith.constant 0 : i32
    %c0_i32_1 = arith.constant 0 : i32
    return %arg1, %c0_i32, %c0_i32_0 : i32, i32, i32
  }
  func.func @transform_4(%arg0: i32, %arg1: i32) -> (i32, i32, i32) {
    %c0_i32 = arith.constant 0 : i32
    %c0_i32_0 = arith.constant 0 : i32
    %c0_i32_1 = arith.constant 0 : i32
    return %arg1, %c0_i32, %c0_i32_0 : i32, i32, i32
  }
  func.func @transform_5(%arg0: i32, %arg1: i32) -> (i32, i32, i32) {
    %c0_i32 = arith.constant 0 : i32
    %c0_i32_0 = arith.constant 0 : i32
    %c0_i32_1 = arith.constant 0 : i32
    return %arg1, %c0_i32, %c0_i32_0 : i32, i32, i32
  }
  func.func @transform_6(%arg0: i32, %arg1: i32) -> (i32, i32, i32) {
    %c0_i32 = arith.constant 0 : i32
    %c0_i32_0 = arith.constant 0 : i32
    %c0_i32_1 = arith.constant 0 : i32
    return %arg0, %c0_i32, %c0_i32_0 : i32, i32, i32
  }
}

</mosaic_0001>

<bundles_post_ra>
// kernel: tpu_custom_call.1
= control target key start
LH: loop header
LB: loop body
LE: loop exit
PB: predicated region body
PF: predicated region fallthrough
CT: control target
= control target key end

     0   :  { %s2617_s0 = inlined_call_operand.vmem [shape: f32[2,8,32], index: 0, kind: input, shape index: {}]   ;;  %s2618_s1 = inlined_call_operand.vmem [shape: bf16[2,3,32,32], index: 1, kind: input, shape index: {}]   ;;  %s2619_s2 = inlined_call_operand.hbm [shape: bf16[2,32,32], index: 2, kind: input, shape index: {}]   ;;  %s2620_s3 = inlined_call_operand.hbm [shape: bf16[2,32,64], index: 3, kind: input, shape index: {}]   ;;  %s2621_s4 = inlined_call_operand.vmem [shape: bf16[2,64,32], index: 4, kind: input, shape index: {}]   ;;  %s2622_s5 = inlined_call_operand.vmem [shape: f32[2,10,64], index: 5, kind: input, shape index: {}]   ;;  %s2623_s6 = inlined_call_operand.hbm [shape: f32[2,8,32], index: 6, kind: output, shape index: {}]  }
   0x1   :  { %2634 = sst [smem:[#allocation21_spill]] %s2619_s2 }
   0x2   :  { %2635 = sst [smem:[#allocation22_spill]] %s2620_s3 }
   0x3   :  { %11 = vsyncpa [#allocation3], 0 }
   0x4   :  { %13 = vsyncpa [#allocation3 + $0x1], 0 }
   0x5   :  { %14 = vsyncpa [#allocation6], 0 }
   0x6   :  { %16 = vsyncpa [#allocation6 + $0x1], 0 }
   0x7   :  { %17 = vsyncpa [#allocation4], 0 }
   0x8   :  { %19 = vsyncpa [#allocation4 + $0x1], 0  ;;  %s2198_s21 = smov 0   ;;  %s2200_s22 = smov 0  }
   0x9   :  { %s2202_s23 = smov 0   ;;  %s2204_s24 = smov 0  }
   0xa   :  { %s2206_s25 = smov 0   ;;  %s2208_s26 = smov 0  }
   0xb   :  { %s2210_s27 = smov 0   ;;  %s2212_s28 = smov 0  }
   0xc   :  { %s2214_s29 = smov 0   ;;  %s2216_s30 = smov 0  }
   0xd   :  { %s2218_s7 = smov 0  }
   0xe LB: > { %2636 = sst [smem:[#allocation11_spill]] %s2119_s23  ;;  %s1607_s8 = sadd.s32 4294967295, %s2151_s7   ;;  %s2151_s7 = sphi %s2218_s7, %s25_s7   ;;  %s2147_s30 = sphi %s2216_s30, %s2665_s30   ;;  %s2143_s29 = sphi %s2214_s29, %s2664_s29   ;;  %s2139_s28 = sphi %s2212_s28, %s2663_s28   ;;  %s2135_s27 = sphi %s2210_s27, %s2662_s27   ;;  %s2131_s26 = sphi %s2208_s26, %s2661_s26   ;;  %s2127_s25 = sphi %s2206_s25, %s2668_s25   ;;  %s2123_s24 = sphi %s2204_s24, %s2659_s24   ;;  %s2119_s23 = sphi %s2202_s23, %s2658_s23   ;;  %s2115_s22 = sphi %s2200_s22, %s2667_s22   ;;  %s2111_s21 = sphi %s2198_s21, %s2666_s21  }
   0xf   : > { %2637 = sst [smem:[#allocation12_spill]] %s2127_s25  ;;  %s1608_s9 = sadd.s32 4294967294, %s2151_s7  }
  0x10   : > { %2638 = sst [smem:[#allocation13_spill]] %s2131_s26  ;;  %s34_s10 = sadd.s32 1, %s2143_s29 }
  0x11   : > { %2639 = sst [smem:[#allocation14_spill]] %s2143_s29  ;;  %s37_s11 = sadd.s32 1, %s2147_s30 }
  0x12   : > { %2640 = sst [smem:[#allocation15_spill]] %s2147_s30  ;;  %p35_p0 = scmp.ge.s32.totalorder %s34_s10, 2 }
  0x13   : > { %s96_s12 = sadd.s32 1, %s2131_s26  ;;  %p103_p1 = scmp.ne.s32.totalorder %s2131_s26, %s2127_s25 }
  0x14   : > { %p104_p2 = scmp.eq.s32.totalorder %s2151_s7, 0  ;;  %s2670_s10 = smov (%p35_p0, %s34_s10), 0 }
  0x15   : > { %2641 = sst [smem:[#allocation16_spill]] %s2670_s10  ;;  %s2672_s11 = smov (!%p35_p0, %s37_s11), %s2147_s30 }
  0x16   : > { %s93_s13 = ssub.s32 %s2143_s29, %s2670_s10  ;;  %p2264_p3 = por %p104_p2, %p103_p1 }
  0x17   : > { %p39_p4 = scmp.ge.s32.totalorder %s2672_s11, 2  ;;  %p94_p5 = scmp.eq.s32.totalorder %s93_s13, 0 }
  0x18   : > { %p109_p6 = scmp.ne.s32.totalorder %s2127_s25, %s2123_s24  ;;  %p110_p7 = scmp.eq.s32.totalorder %s1607_s8, 0 }
  0x19   : > { %s2674_s11 = smov (%p39_p4, %s2672_s11), 0  ;;  %s200_s18 = sadd.s32 1, %s2119_s23 }
  0x1a   : > { %2643 = sst [smem:[#allocation17_spill]] %s2674_s11  ;;  %p2274_p8 = por %p110_p7, %p109_p6 }
  0x1b   : > { %s2272_s15 = scalar_select %p94_p5, %s2131_s26, %s96_s12  }
  0x1c   : > { %s197_s17 = ssub.s32 %s2147_s30, %s2674_s11  ;;  %p210_p10 = scmp.ne.s32.totalorder %s2119_s23, %s2115_s22 }
  0x1d   : > { %2644 = sst [smem:[#allocation18_spill]] %s2272_s15  ;;  %p198_p9 = scmp.eq.s32.totalorder %s197_s17, 0 }
  0x1e   : > { %p211_p11 = scmp.eq.s32.totalorder %s1607_s8, 3  ;;  %p216_p13 = scmp.ne.s32.totalorder %s2115_s22, %s2111_s21 }
  0x1f   : > { %s2284_s19 = scalar_select %p198_p9, %s2119_s23, %s200_s18  }
  0x20   : > { %p2286_p12 = por %p211_p11, %p210_p10  ;;  %p217_p0 = scmp.eq.s32.totalorder %s1608_s9, 3 }
  0x21   : > { %2646 = sst [smem:[#allocation19_spill]] %s2284_s19  ;;  %p1840_p1 = scmp.lt.s32.totalorder %s2151_s7, 4 }
  0x22   : > { %s2294_s24 = sand.u32 1, %s2131_s26   ;;  %p2296_p2 = por %p217_p0, %p216_p13 }
  0x23   : > { %s2628_s13 = sshll.u32 %s2294_s24, 4  ;;  %s1661_s8 = sshll.u32 %s2143_s29, 8 }
  0x24   : > { %s2648_s12 = scalar_select %p2296_p2, 1, 0 }
  0x25   : > { %s2650_s2 = sld [smem:[#allocation21_spill]]  ;;  %s256_s10 = scalar_lea.vmem [#allocation2], %s2628_s13 }
  0x26   : > { %2649 = sst [smem:[#allocation20_spill]] %s2648_s12  ;;  %s263_s30 = sshll.u32 %s256_s10, 4  ;;  %s264_s30 = int_to_ptr.vmem [resolvable:$true] %s263_s30 }
  0x27   : > { %p2309_p4 = pnand %p1840_p1, %p2264_p3  ;;  %s253_s15 = scalar_lea.sflag [#allocation3], %s2294_s24 }
  0x28   : > { %s1984_s26 = scalar_lea.vmem %s264_s30, 256  ;;  %s2153_s17 = smov [#allocation2]  }
  0x29   : > { %p1973_p5 = pneg %p2309_p4  ;;  %p1985_p6 = scmp.ne.s32.totalorder %s264_s30, %s1984_s26 }
  0x2a   : > { %s1989_s18 = sshll.u32 %s2153_s17, 4  ;;  %s1990_s18 = int_to_ptr.vmem [resolvable:$false] %s1989_s18 }
  0x2b   : > { %s262_s11 = scalar_lea.hbm %s2650_s2, %s1661_s8  ;;  %p1987_p7 = pnand %p1985_p6, %p1973_p5 }
  0x2c   : > { %s1991_s10 = scalar_lea.vmem %s1990_s18, 512  ;;  %p1992_p3 = scmp.lt.s32.totalorder %s264_s30, %s1990_s18 }
  0x2d   : > { %p1988_p9 = pneg %p1987_p7  ;;  %p1993_p10 = scmp.lt.s32.totalorder %s1991_s10, %s1984_s26 }
  0x2f   : > { %p1994_p11 = por %p1993_p10, %p1992_p3 }
  0x31   : > { %p1995_p13 = pnand %p1994_p11, %p1988_p9 }
  0x33   : > { %1998 = shalt.err (!%p1995_p13)
}
  0x34   : > { %s2154_s14 = smov 64   ;;  %s2155_s13 = smov 4  }
  0x35   : > { %1832 = dma.hbm_to_vmem [thread:$0]  (!%p2309_p4), %s262_s11, 256, %s264_s30, %s253_s15, %s2154_s14, %s2154_s14, %s2155_s13  }
  0x36   : > { %p1617_p0 = scmp.ge.s32.totalorder %s2151_s7, 1  ;;  %p308_p1 = scmp.lt.s32.totalorder %s2151_s7, 5 }
  0x37   : > { %s2653_s3 = sld [smem:[#allocation22_spill]]  ;;  %s2654_s2 = sshll.u32 %s2294_s24, 4 }
  0x38   : > { %p2323_p6 = pnand %p1617_p0, %p308_p1  ;;  %s277_s29 = scalar_lea.vmem [#allocation5], %s2654_s2 }
  0x39   : > { %s284_s19 = sshll.u32 %s277_s29, 4  ;;  %s274_s23 = scalar_lea.sflag [#allocation6], %s2294_s24  ;;  %s285_s19 = int_to_ptr.vmem [resolvable:$true] %s284_s19 }
  0x3a   : > { %s2012_s12 = scalar_lea.vmem %s285_s19, 256  ;;  %s2156_s30 = smov [#allocation5]  }
  0x3b   : > { %p2013_p7 = scmp.ne.s32.totalorder %s285_s19, %s2012_s12  ;;  %s2017_s11 = sshll.u32 %s2156_s30, 4  ;;  %s2018_s11 = int_to_ptr.vmem [resolvable:$false] %s2017_s11 }
  0x3c   : > { %s2019_s15 = scalar_lea.vmem %s2018_s11, 512  ;;  %p2020_p10 = scmp.lt.s32.totalorder %s285_s19, %s2018_s11 }
  0x3d   : > { %s283_s10 = scalar_lea.hbm %s2653_s3, %s1661_s8  ;;  %p2015_p9 = pnand %p2013_p7, %p1973_p5 }
  0x3e   : > { %p2021_p11 = scmp.lt.s32.totalorder %s2019_s15, %s2012_s12 }
  0x3f   : > { %p2016_p3 = pneg %p2015_p9 }
  0x40   : > { %p2022_p13 = por %p2021_p11, %p2020_p10 }
  0x42   : > { %p2023_p0 = pnand %p2022_p13, %p2016_p3 }
  0x44   : > { %2026 = shalt.err (!%p2023_p0)
}
  0x45   : > { %1835 = dma.hbm_to_vmem [thread:$0]  (!%p2309_p4), %s283_s10, 256, %s285_s19, %s274_s23, %s2154_s14, %s2154_s14, %s2155_s13  }
  0x46   : > { %312 = sbr.rel (%p2323_p6) target bundleno = 3609 (0xe19), region = 44  ;;  %s314_s2 = sand.u32 (!%p2323_p6), 1, %s2127_s25  }
  0x47   : > { %s1618_s29 = sshll.u32 (!%p2323_p6), %s314_s2, 4  ;;  %s315_s24 = scalar_lea.sflag (!%p2323_p6), [#allocation3], %s314_s2 }
  0x48   : > { %s2341_s8 = scalar_lea.vmem (!%p2323_p6), [#allocation2], %s1618_s29 }
  0x4b   : > { %2098 = dma.done.wait (%p2274_p8), %s315_s24, 256  }
  0x4c   : > { %2100 = vsyncadd (%p2274_p8), %s315_s24, 4294967040  ;;  %s324_s12 = scalar_lea.sflag [#allocation6], %s314_s2  ;;  %s2347_s26 = scalar_lea.vmem [#allocation5], %s1618_s29 }
  0x4d   : > { %2102 = dma.done.wait (%p2274_p8), %s324_s12, 256  }
  0x4e   : > { %2104 = vsyncadd (%p2274_p8), %s324_s12, 4294967040  ;;  %s2632_s23 = sand.u32 1, %s2115_s22   ;;  %p380_p4 = scmp.lt.s32.totalorder %s2139_s28, 1 }
  0x4f   : > { %s1620_s19 = sshll.u32 %s2632_s23, 3  ;;  %p384_p5 = scmp.lt.s32.totalorder %s2135_s27, 1 }
  0x50   : > { %s381_s13 = scalar_select %p380_p4, %s2139_s28, 1 }
  0x51   : > { %s385_s9 = scalar_select %p384_p5, %s2135_s27, 1 }
  0x52   : > { %s1621_s14 = sshll.u32 %s381_s13, 3  ;;  %s2378_s17 = scalar_lea.vmem [#allocation7], %s1620_s19 }
  0x53   : > { %s383_s10 = scalar_lea.vmem %s2617_s0, %s1621_s14  ;;  %s1822_s16 = smul.u32 48, %s385_s9 }
  0x54   : > { %s1663_s30 = sshll.u32 %s385_s9, 5  ;;  %s1664_s11 = sshll.u32 %s385_s9, 4 }
  0x55   : > { %s2366_s29 = scalar_lea.vmem %s2618_s1, %s1822_s16  ;;  %s2371_s23 = scalar_lea.vmem %s2621_s4, %s1663_s30 }
  0x56   : > { %s2376_s13 = scalar_lea.vmem %s2622_s5, %s1664_s11  ;;  %p1627_p8 = scmp.ne.s32.totalorder %s2135_s27, 0 }
  0x58   : > { %403 = sbr.rel (%p1627_p8) target bundleno = 95 (0x5f), region = 56 }
  0x5d   : > { %v404_v0 = vld [vmem:[%s383_s10] sm:$0xff]  ;;  %vm405_vm0 = vcmask 261120  }
  0x5e   : > { %406 = vst.msk [vmem:[%s2378_s17] sm:$0xff] %vm405_vm0, %v404_v0 }
  0x5f PF: > { %v1937_v1 = vld [vmem:[%s2366_s29 + $0x8] sm:$0xff]   ;;  %v2157_v2 = vmov 0.0   ;;  %v1938_v3 = vld [vmem:[%s2366_s29] sm:$0xff]   ;;  %vm2158_vm1 = vmmov 0   ;;  %vm455_vm2 = vcmask 261120   ;;  %v1939_v6 = vld [vmem:[%s2366_s29 + $0x18] sm:$0xff]   ;;  %v439_v8 = vlaneseq }
  0x60   : > { %1706 = vmatprep.subr.bf16.mxu1 %v2157_v2  ;;  %1722 = vmatprep.subr.bf16.mxu0 %v2157_v2  ;;  %v1940_v7 = vld [vmem:[%s2366_s29 + $0x10] sm:$0xff]   ;;  %v2412_v14 = vld [vmem:[%s2376_s13] sm:$0xff]  ;;  %vm614_vm3 = vcmask 64512   ;;  %s2159_s3 = smov 120   ;;  %v1941_v28 = vld [vmem:[%s2366_s29 + $0x28] sm:$0xff]   ;;  %vm677_vm4 = vcmask 1043456  }
  0x61   : > { %1707 = vmatpush3.bf16.msra.mxu1 %v1937_v1  ;;  %1710 = vmatprep.mubr.msk.bf16.mxu1 %vm2158_vm1, %v2157_v2  ;;  %v2407_v9 = vshrl.u32 %v439_v8, 7  ;;  %v1942_v29 = vld [vmem:[%s2366_s29 + $0x20] sm:$0xff]   ;;  %s2160_s25 = smov 112   ;;  %s2161_s27 = smov 104   ;;  %vm1372_vm5 = vcmask 523264  }
  0x62   : > { %1708 = vmatprep.subr.bf16.mxu1 %v2157_v2  ;;  %1726 = vmatprep.mubr.msk.bf16.mxu0 %vm2158_vm1, %v2157_v2  ;;  %s2655_s14 = sand.u32 1, %s2115_s22   ;;  %s2162_s16 = smov [#allocation7]  }
  0x63   : > { %v501_v11 = vsub.s32 1, %v2407_v9  ;;  %v441_v13 = vsub.s32 0, %v2407_v9  ;;  %1723 = vmatpush3.bf16.msra.mxu0 %v1941_v28  ;;  %v557_v54 = vsub.s32 2, %v2407_v9  ;;  %s1442_s18 = scalar_lea.sflag [#allocation4], %s2655_s14  ;;  %s2031_s30 = sshll.u32 %s2162_s16, 4  ;;  %s2032_s30 = int_to_ptr.vmem [resolvable:$false] %s2031_s30 }
  0x64   : > { %1724 = vmatprep.subr.bf16.mxu0 %v2157_v2 }
  0x65   : > { %v2389_v4 = vld [vmem:[%s2378_s17] sm:$0xff]  ;;  %1709 = vmatpush3.bf16.msra.mxu1 %v1938_v3  ;;  %v502_v16 = vrot.slane %v2412_v14, %v501_v11  ;;  %v442_v18 = vrot.slane %v2412_v14, %v441_v13  ;;  %v558_v55 = vrot.slane %v2412_v14, %v557_v54 }
  0x66   : > { %v438_v5 = vpack.c.bf16 %v2389_v4, %v2389_v4  ;;  %1714 = vmatprep.subr.bf16.mxu1 %v2157_v2 }
  0x67   : > { %1725 = vmatpush3.bf16.msra.mxu0 %v1942_v29 }
  0x68   : > { %1711 = vmatmul.mubr.msk.bf16.vlgmr.msra.gmra.mxu1 %vm455_vm2, %v438_v5  ;;  %1736 = vmatprep.subr.bf16.mxu0 %v2157_v2 }
  0x69   : > { %1715 = vmatpush3.bf16.msra.mxu1 %v1939_v6  ;;  %1718 = vmatprep.mubr.msk.bf16.mxu1 %vm2158_vm1, %v2157_v2  ;;  %v421_v6 = vld [vmem:[%s2341_s8 + $0x4] sm:$0xf] }
  0x6a   : > { %1716 = vmatprep.subr.bf16.mxu1 %v2157_v2  ;;  %1727 = vmatmul.mubr.msk.bf16.vlgmr.msra.gmra.mxu0 %vm455_vm2, %v438_v5 }
  0x6b   : > { %1738 = vmatprep.mubr.msk.bf16.mxu0 %vm2158_vm1, %v2157_v2 }
  0x6d   : > { %1717 = vmatpush3.bf16.msra.mxu1 %v1940_v7  ;;  %v841_v7 = vsel %vm677_vm4, %v421_v6, 0 }
  0x6e   : > { %1730 = vmatprep.subr.bf16.mxu1 %v2157_v2 }
  0x70   : > { %1719 = vmatmul.mubr.msk.bf16.vlgmr.msra.gmra.mxu1 %vm455_vm2, %v438_v5 }
  0x71   : > { %1732 = vmatprep.mubr.msk.bf16.mxu1 %vm2158_vm1, %v2157_v2 }
 0x128   : > { %v493_v10 = vpop.f32.mrf.mxu1 }
 0x129   : > { %v494_v22 = vadd.f32 %v493_v10, %v442_v18 }
 0x12a   : > { %v1712_v12 = vpop.f32.mrf.mxu1  ;;  %v605_v48 = vpop.f32.mrf.mxu0 }
 0x12b   : > { %v2426_v27 = vpack.c.bf16 %v494_v22, %v494_v22  ;;  %v606_v56 = vadd.f32 %v605_v48, %v558_v55 }
 0x12c   : > { %v496_v15 = vpop.f32.mrf.mxu1  ;;  %v1728_v49 = vpop.f32.mrf.mxu0 }
 0x12d   : > { %v2452_v57 = vpack.c.bf16 %v606_v56, %v606_v56 }
 0x12e   : > { %v1713_v17 = vpop.f32.mrf.mxu1  ;;  %v608_v50 = vpop.f32.mrf.mxu0 }
 0x12f   : > { %v679_v58 = vsel %vm677_vm4, %v2452_v57, 0 }
 0x130   : > { %v549_v19 = vpop.f32.mrf.mxu1  ;;  %v1729_v51 = vpop.f32.mrf.mxu0  ;;  %1737 = vmatpush3.bf16.msra.mxu0 %v679_v58 }
 0x131   : > { %v550_v20 = vadd.f32 %v549_v19, %v502_v16  ;;  %1748 = vmatprep.subr.bf16.mxu0 %v2157_v2  ;;  %v420_v16 = vld [vmem:[%s2341_s8] sm:$0xf] }
 0x132   : > { %v1720_v21 = vpop.f32.mrf.mxu1  ;;  %v887_v19 = vsel %vm677_vm4, %v420_v16, 0 }
 0x133   : > { %v2420_v23 = vpack.c.bf16 %v550_v20, %v550_v20 }
 0x134   : > { %v552_v24 = vpop.f32.mrf.mxu1 }
 0x135   : > { %726 = vrot.lane.b32.xlu0 %v2420_v23, %s2159_s3  ;;  %v619_v25 = vsel %vm614_vm3, %v2420_v23, 0 }
 0x136   : > { %v1721_v26 = vpop.f32.mrf.mxu1  ;;  %1731 = vmatpush3.bf16.xpose.msra.mxu1 %v619_v25 }
 0x137   : > { %1742 = vmatprep.subr.bf16.mxu1 %v2157_v2 }
 0x139   : > { %723 = vrot.lane.b32.xlu0 %v2426_v27, %s2159_s3 }
 0x13d   : > { %1733 = vmatmul.mubr.msk.bf16.vlgmr.msra.gmra.mxu1 %vm614_vm3, %v2426_v27 }
 0x13e   : > { %1744 = vmatprep.mubr.msk.bf16.mxu1 %vm2158_vm1, %v2157_v2 }
 0x1a7   : > { %v727_v30 = vpop.permute.xlu0 %726 }
 0x1a8   : > { %v732_v31 = vsel %vm614_vm3, %v727_v30, 0 }
 0x1a9   : > { %1743 = vmatpush3.bf16.xpose.msra.mxu1 %v732_v31 }
 0x1aa   : > { %1754 = vmatprep.subr.bf16.mxu1 %v2157_v2 }
 0x1ab   : > { %v724_v32 = vpop.permute.xlu0 %723 }
 0x1b0   : > { %1745 = vmatmul.mubr.msk.bf16.vlgmr.msra.gmra.mxu1 %vm614_vm3, %v724_v32 }
 0x1b1   : > { %1756 = vmatprep.mubr.msk.bf16.mxu1 %vm2158_vm1, %v2157_v2  ;;  %1755 = vmatpush3.bf16.msra.mxu1 %v841_v7 }
 0x1b2   : > { %1766 = vmatprep.subr.bf16.mxu1 %v2157_v2 }
 0x1fd   : > { %v655_v33 = vpop.f32.mrf.mxu1 }
 0x1fe   : > { %v661_v34 = vmul.f32 0.35355338, %v655_v33 }
 0x1ff   : > { %v1734_v35 = vpop.f32.mrf.mxu1 }
 0x200   : > { %v662_v36 = vsel %vm614_vm3, %v661_v34, -inf }
 0x201   : > { %663 = vmax.xlane.f32.xlu1 %v662_v36  ;;  %v658_v37 = vpop.f32.mrf.mxu1 }
 0x203   : > { %v1735_v38 = vpop.f32.mrf.mxu1 }
 0x270   : > { %v768_v39 = vpop.f32.mrf.mxu1 }
 0x271   : > { %v774_v40 = vmul.f32 0.35355338, %v768_v39 }
 0x272   : > { %v1746_v41 = vpop.f32.mrf.mxu1 }
 0x273   : > { %v775_v42 = vsel %vm614_vm3, %v774_v40, -inf }
 0x274   : > { %776 = vmax.xlane.f32.xlu1 %v775_v42  ;;  %v771_v43 = vpop.f32.mrf.mxu1 }
 0x276   : > { %v1747_v44 = vpop.f32.mrf.mxu1 }
 0x28a   : > { %v664_v45 = vpop.xlane.xlu1 %663 }
 0x28b   : > { %v665_v46 = vsub.f32 %v661_v34, %v664_v45 }
 0x28d   : > { %v666_v47 = vmul.f32 1.442695, %v665_v46 }
 0x28f   : > { %1949 = vpow2.f32 %v666_v47 }
 0x29c   : > { %v1950_v52 = vpop.eup %1949 }
 0x29d   : > { %v668_v53 = vsel %vm614_vm3, %v1950_v52, 0.0 }
 0x29e   : > { %669 = vadd.xlane.f32.xlu0 %v668_v53 }
 0x2b4   : > { %992 = vrot.lane.b32.xlu0 %v2452_v57, %s2160_s25 }
 0x2fd   : > { %v777_v59 = vpop.xlane.xlu1 %776 }
 0x2fe   : > { %v778_v60 = vsub.f32 %v774_v40, %v777_v59 }
 0x300   : > { %v779_v61 = vmul.f32 1.442695, %v778_v60 }
 0x302   : > { %1951 = vpow2.f32 %v779_v61 }
 0x30f   : > { %v1952_v62 = vpop.eup %1951 }
 0x310   : > { %v781_v63 = vsel %vm614_vm3, %v1952_v62, 0.0 }
 0x311   : > { %782 = vadd.xlane.f32.xlu1 %v781_v63 }
 0x322   : > { %788 = vrot.lane.b32.xlu1 %v2452_v57, %s2159_s3 }
 0x326   : > { %931 = vrot.lane.b32.xlu1 %v2420_v23, %s2160_s25 }
 0x327   : > { %v670_v0 = vpop.xlane.xlu0 %669 }
 0x328   : > { %1953 = vrcp.f32 %v670_v0 }
 0x32a   : > { %929 = vrot.lane.b32.xlu1 %v2426_v27, %s2160_s25 }
 0x32b   : > { %v993_v20 = vpop.permute.xlu0 %992 }
 0x32c   : > { %v998_v25 = vsel %vm677_vm4, %v993_v20, 0 }
 0x335   : > { %v1954_v1 = vpop.eup %1953 }
 0x336   : > { %v672_v3 = vmul.f32 %v1954_v1, %v1950_v52 }
 0x338   : > { %v673_v5 = vpack.c.bf16 %v672_v3, %v672_v3 }
 0x33a   : > { %1739 = vmatmul.mubr.msk.bf16.vlgmr.msra.gmra.mxu0 %vm614_vm3, %v673_v5 }
 0x33b   : > { %1750 = vmatprep.mubr.msk.bf16.mxu0 %vm2158_vm1, %v2157_v2 }
 0x39a   : > { %v783_v8 = vpop.xlane.xlu1 %782 }
 0x39b   : > { %1955 = vrcp.f32 %v783_v8 }
 0x39e   : > { %v789_v10 = vpop.permute.xlu1 %788 }
 0x39f   : > { %v794_v12 = vsel %vm677_vm4, %v789_v10, 0 }
 0x3a0   : > { %1749 = vmatpush3.bf16.msra.mxu0 %v794_v12 }
 0x3a1   : > { %1760 = vmatprep.subr.bf16.mxu0 %v2157_v2 }
 0x3a2   : > { %v932_v29 = vpop.permute.xlu1 %931 }
 0x3a3   : > { %v937_v33 = vsel %vm614_vm3, %v932_v29, 0 }
 0x3a6   : > { %v930_v36 = vpop.permute.xlu1 %929 }
 0x3a8   : > { %v1956_v15 = vpop.eup %1955 }
 0x3a9   : > { %v785_v17 = vmul.f32 %v1956_v15, %v1952_v62 }
 0x3ab   : > { %v786_v18 = vpack.c.bf16 %v785_v17, %v785_v17 }
 0x3ad   : > { %1751 = vmatmul.mubr.msk.bf16.vlgmr.msra.gmra.mxu0 %vm614_vm3, %v786_v18 }
 0x3ae   : > { %1761 = vmatpush3.bf16.msra.mxu0 %v887_v19  ;;  %1762 = vmatprep.mubr.msk.bf16.mxu0 %vm2158_vm1, %v2157_v2 }
 0x3af   : > { %1772 = vmatprep.subr.bf16.mxu0 %v2157_v2 }
 0x3fa   : > { %v715_v21 = vpop.f32.mrf.mxu0 }
 0x3fb   : > { %v721_v22 = vpack.c.bf16 %v715_v21, %v715_v21 }
 0x3fc   : > { %v1740_v24 = vpop.f32.mrf.mxu0 }
 0x3fd   : > { %1763 = vmatmul.mubr.msk.bf16.vlgmr.msra.gmra.mxu0 %vm614_vm3, %v721_v22 }
 0x3fe   : > { %1773 = vmatpush3.bf16.msra.mxu0 %v998_v25  ;;  %v718_v26 = vpop.f32.mrf.mxu0  ;;  %1774 = vmatprep.mubr.msk.bf16.mxu0 %vm2158_vm1, %v2157_v2 }
 0x3ff   : > { %1784 = vmatprep.subr.bf16.mxu0 %v2157_v2 }
 0x400   : > { %v1741_v28 = vpop.f32.mrf.mxu0 }
 0x401   : > { %v423_v28 = vld [vmem:[%s2341_s8 + $0xc] sm:$0xf] }
 0x402   : > { %v1204_v29 = vsel %vm677_vm4, %v423_v28, 0 }
 0x46d   : > { %v830_v30 = vpop.f32.mrf.mxu0 }
 0x46e   : > { %v836_v31 = vpack.c.bf16 %v830_v30, %v830_v30 }
 0x46f   : > { %v1752_v32 = vpop.f32.mrf.mxu0 }
 0x470   : > { %1757 = vmatmul.mubr.msk.bf16.vlgmr.msra.gmra.mxu1 %vm614_vm3, %v836_v31 }
 0x471   : > { %1767 = vmatpush3.bf16.xpose.msra.mxu1 %v937_v33  ;;  %v833_v34 = vpop.f32.mrf.mxu0  ;;  %1768 = vmatprep.mubr.msk.bf16.mxu1 %vm2158_vm1, %v2157_v2 }
 0x472   : > { %1778 = vmatprep.subr.bf16.mxu1 %v2157_v2 }
 0x473   : > { %v1753_v35 = vpop.f32.mrf.mxu0 }
 0x478   : > { %1769 = vmatmul.mubr.msk.bf16.vlgmr.msra.gmra.mxu1 %vm614_vm3, %v930_v36 }
 0x479   : > { %1780 = vmatprep.mubr.msk.bf16.mxu1 %vm2158_vm1, %v2157_v2 }
 0x4bd   : > { %v2490_v37 = vpop.f32.mrf.mxu0 }
 0x4bf   : > { %v1764_v38 = vpop.f32.mrf.mxu0 }
 0x4c1   : > { %v926_v39 = vpop.f32.mrf.mxu0 }
 0x4c3   : > { %v1765_v40 = vpop.f32.mrf.mxu0 }
 0x530   : > { %v877_v41 = vpop.f32.mrf.mxu1 }
 0x531   : > { %v924_v22 = vadd.f32 %v2490_v37, %v877_v41 }
 0x532   : > { %v1758_v42 = vpop.f32.mrf.mxu1 }
 0x533   : > { %v1249_v42 = vsub.s32 3, %v2407_v9 }
 0x534   : > { %v880_v43 = vpop.f32.mrf.mxu1 }
 0x535   : > { %v1250_v43 = vrot.slane %v2412_v14, %v1249_v42 }
 0x536   : > { %v1759_v44 = vpop.f32.mrf.mxu1 }
 0x538   : > { %v973_v45 = vpop.f32.mrf.mxu1 }
 0x539   : > { %v979_v46 = vmul.f32 0.35355338, %v973_v45 }
 0x53a   : > { %v1770_v47 = vpop.f32.mrf.mxu1 }
 0x53b   : > { %v980_v48 = vsel %vm614_vm3, %v979_v46, -inf }
 0x53c   : > { %981 = vmax.xlane.f32.xlu1 %v980_v48  ;;  %v976_v49 = vpop.f32.mrf.mxu1 }
 0x53e   : > { %v1771_v50 = vpop.f32.mrf.mxu1 }
 0x5c5   : > { %v982_v51 = vpop.xlane.xlu1 %981 }
 0x5c6   : > { %v983_v52 = vsub.f32 %v979_v46, %v982_v51 }
 0x5c8   : > { %v984_v53 = vmul.f32 1.442695, %v983_v52 }
 0x5ca   : > { %1957 = vpow2.f32 %v984_v53 }
 0x5d7   : > { %v1958_v54 = vpop.eup %1957 }
 0x5d8   : > { %v986_v55 = vsel %vm614_vm3, %v1958_v54, 0.0 }
 0x5d9   : > { %987 = vadd.xlane.f32.xlu0 %v986_v55 }
 0x5ef   : > { %1090 = vrot.lane.b32.xlu0 %v2420_v23, %s2161_s27 }
 0x5f3   : > { %1088 = vrot.lane.b32.xlu0 %v2426_v27, %s2161_s27  ;;  %v422_v27 = vld [vmem:[%s2341_s8 + $0x8] sm:$0xf]  ;;  %s1658_s8 = sshll.u32 %s2139_s28, 7  ;;  %s2033_s28 = scalar_lea.vmem %s2032_s30, 256 }
 0x5f4   : > { %v1045_v63 = vsel %vm677_vm4, %v422_v27, 0  ;;  %s1453_s9 = scalar_lea.hbm %s2623_s6, %s1658_s8 }
 0x5f5   : > { %1779 = vmatpush3.bf16.msra.mxu1 %v1045_v63 }
 0x5f6   : > { %1790 = vmatprep.subr.bf16.mxu1 %v2157_v2 }
 0x662   : > { %v988_v56 = vpop.xlane.xlu0 %987 }
 0x663   : > { %1959 = vrcp.f32 %v988_v56 }
 0x666   : > { %v1091_v60 = vpop.permute.xlu0 %1090 }
 0x667   : > { %v1096_v62 = vsel %vm614_vm3, %v1091_v60, 0 }
 0x66a   : > { %v1089_v23 = vpop.permute.xlu0 %1088 }
 0x670   : > { %v1960_v58 = vpop.eup %1959 }
 0x671   : > { %v990_v59 = vmul.f32 %v1960_v58, %v1958_v54  ;;  %v1943_v58 = vld [vmem:[%s2347_s26 + $0x8] sm:$0xff]  }
 0x673   : > { %v991_v61 = vpack.c.bf16 %v990_v59, %v990_v59  ;;  %v1944_v59 = vld [vmem:[%s2347_s26] sm:$0xff]   ;;  %s1455_s26 = sshll.u32 %s2378_s17, 4  ;;  %s1456_s26 = int_to_ptr.vmem [resolvable:$true] %s1455_s26 }
 0x674   : > { %s2027_s10 = scalar_lea.vmem %s1456_s26, 128  ;;  %p2034_p9 = scmp.lt.s32.totalorder %s1456_s26, %s2032_s30 }
 0x675   : > { %1775 = vmatmul.mubr.msk.bf16.vlgmr.msra.gmra.mxu0 %vm614_vm3, %v991_v61  ;;  %p2028_p1 = scmp.ne.s32.totalorder %s1456_s26, %s2027_s10  ;;  %p2035_p3 = scmp.lt.s32.totalorder %s2033_s28, %s2027_s10 }
 0x676   : > { %1785 = vmatpush3.bf16.xpose.msra.mxu0 %v1096_v62  ;;  %1786 = vmatprep.mubr.msk.bf16.mxu0 %vm2158_vm1, %v2157_v2  ;;  %v1269_v62 = vsub.s32 6, %v2407_v9 }
 0x677   : > { %1796 = vmatprep.subr.bf16.mxu0 %v2157_v2  ;;  %p2029_p6 = pnand %p2028_p1, %p2286_p12  ;;  %p2036_p10 = por %p2035_p3, %p2034_p9 }
 0x678   : > { %v1270_v27 = vrot.slane %v2412_v14, %v1269_v62 }
 0x679   : > { %p2030_p7 = pneg %p2029_p6 }
 0x67b   : > { %p2037_p11 = pnand %p2036_p10, %p2030_p7 }
 0x67d   : > { %1787 = vmatmul.mubr.msk.bf16.vlgmr.msra.gmra.mxu0 %vm614_vm3, %v1089_v23  ;;  %v1274_v23 = vsub.s32 7, %v2407_v9 }
 0x67e   : > { %1798 = vmatprep.mubr.msk.bf16.mxu0 %vm2158_vm1, %v2157_v2  ;;  %1797 = vmatpush3.bf16.msra.mxu0 %v1204_v29 }
 0x67f   : > { %1810 = vmatprep.subr.bf16.mxu0 %v2157_v2 }
 0x735   : > { %v1034_v0 = vpop.f32.mrf.mxu0 }
 0x736   : > { %v1040_v1 = vpack.c.bf16 %v1034_v0, %v1034_v0 }
 0x737   : > { %v1776_v3 = vpop.f32.mrf.mxu0 }
 0x738   : > { %1781 = vmatmul.mubr.msk.bf16.vlgmr.msra.gmra.mxu1 %vm614_vm3, %v1040_v1  ;;  %v1275_v1 = vrot.slane %v2412_v14, %v1274_v23 }
 0x739   : > { %v1037_v5 = vpop.f32.mrf.mxu0  ;;  %1792 = vmatprep.mubr.msk.bf16.mxu1 %vm2158_vm1, %v2157_v2 }
 0x73b   : > { %v1777_v6 = vpop.f32.mrf.mxu0 }
 0x73d   : > { %v1132_v7 = vpop.f32.mrf.mxu0 }
 0x73e   : > { %v1138_v8 = vmul.f32 0.35355338, %v1132_v7  ;;  %v1945_v7 = vld [vmem:[%s2371_s23 + $0x18] sm:$0xff]  }
 0x73f   : > { %v1788_v10 = vpop.f32.mrf.mxu0 }
 0x740   : > { %v1139_v12 = vsel %vm614_vm3, %v1138_v8, -inf  ;;  %v1947_v10 = vld [vmem:[%s2371_s23 + $0x8] sm:$0xff]  }
 0x741   : > { %1140 = vmax.xlane.f32.xlu0 %v1139_v12  ;;  %v1135_v15 = vpop.f32.mrf.mxu0  ;;  %v1948_v12 = vld [vmem:[%s2371_s23] sm:$0xff]  }
 0x742   : > { %v1280_v15 = vsub.s32 4, %v2407_v9 }
 0x743   : > { %v1789_v16 = vpop.f32.mrf.mxu0 }
 0x744   : > { %v1281_v16 = vrot.slane %v2412_v14, %v1280_v15 }
 0x7ca   : > { %v1141_v17 = vpop.xlane.xlu0 %1140 }
 0x7cb   : > { %v1142_v18 = vsub.f32 %v1138_v8, %v1141_v17  ;;  %v1946_v8 = vld [vmem:[%s2371_s23 + $0x10] sm:$0xff]  }
 0x7cd   : > { %v1143_v19 = vmul.f32 1.442695, %v1142_v18 }
 0x7cf   : > { %1961 = vpow2.f32 %v1143_v19 }
 0x7dc   : > { %v1962_v20 = vpop.eup %1961 }
 0x7dd   : > { %v1145_v21 = vsel %vm614_vm3, %v1962_v20, 0.0 }
 0x7de   : > { %1146 = vadd.xlane.f32.xlu1 %v1145_v21 }
 0x7ef   : > { %1151 = vrot.lane.b32.xlu1 %v2452_v57, %s2161_s27 }
 0x7f8   : > { %v1081_v24 = vpop.f32.mrf.mxu1 }
 0x7f9   : > { %v1087_v25 = vadd.f32 %v1081_v24, %v924_v22 }
 0x7fa   : > { %v1782_v26 = vpop.f32.mrf.mxu1 }
 0x7fc   : > { %v1084_v30 = vpop.f32.mrf.mxu1 }
 0x7fe   : > { %v1783_v31 = vpop.f32.mrf.mxu1 }
 0x867   : > { %v1147_v32 = vpop.xlane.xlu1 %1146 }
 0x868   : > { %1963 = vrcp.f32 %v1147_v32 }
 0x86b   : > { %v1152_v33 = vpop.permute.xlu1 %1151 }
 0x86c   : > { %v1157_v34 = vsel %vm677_vm4, %v1152_v33, 0 }
 0x86d   : > { %1791 = vmatpush3.bf16.msra.mxu1 %v1157_v34 }
 0x86e   : > { %1802 = vmatprep.subr.bf16.mxu1 %v2157_v2 }
 0x875   : > { %v1964_v57 = vpop.eup %1963 }
 0x876   : > { %v1149_v35 = vmul.f32 %v1964_v57, %v1962_v20 }
 0x878   : > { %v1150_v36 = vpack.c.bf16 %v1149_v35, %v1149_v35 }
 0x87a   : > { %1793 = vmatmul.mubr.msk.bf16.vlgmr.msra.gmra.mxu1 %vm614_vm3, %v1150_v36 }
 0x87b   : > { %1806 = vmatprep.mubr.msk.bf16.mxu1 %vm2158_vm1, %v2157_v2  ;;  %1803 = vmatpush3.bf16.msra.mxu1 %v1943_v58 }
 0x87c   : > { %1804 = vmatprep.subr.bf16.mxu1 %v2157_v2 }
 0x87f   : > { %1805 = vmatpush3.bf16.msra.mxu1 %v1944_v59 }
 0x93a   : > { %v1193_v37 = vpop.f32.mrf.mxu1 }
 0x93b   : > { %v1199_v38 = vpack.c.bf16 %v1193_v37, %v1193_v37 }
 0x93c   : > { %v1794_v39 = vpop.f32.mrf.mxu1 }
 0x93d   : > { %1799 = vmatmul.mubr.msk.bf16.vlgmr.msra.gmra.mxu0 %vm614_vm3, %v1199_v38 }
 0x93e   : > { %v1196_v40 = vpop.f32.mrf.mxu1  ;;  %1818 = vmatprep.mubr.msk.bf16.mxu0 %vm2158_vm1, %v2157_v2  ;;  %1811 = vmatpush3.bf16.msra.mxu0 %v1945_v7 }
 0x93f   : > { %1812 = vmatprep.subr.bf16.mxu0 %v2157_v2 }
 0x940   : > { %v1795_v41 = vpop.f32.mrf.mxu1 }
 0x942   : > { %1813 = vmatpush3.bf16.msra.mxu0 %v1946_v8 }
 0x943   : > { %1814 = vmatprep.subr.bf16.mxu0 %v2157_v2 }
 0x946   : > { %1815 = vmatpush3.bf16.msra.mxu0 %v1947_v10 }
 0x947   : > { %1816 = vmatprep.subr.bf16.mxu0 %v2157_v2  ;;  %v1346_v2 = vsub.s32 5, %v2407_v9 }
 0x949   : > { %v1347_v30 = vrot.slane %v2412_v14, %v1346_v2 }
 0x94a   : > { %1817 = vmatpush3.bf16.msra.mxu0 %v1948_v12 }
 0x9fd   : > { %v1240_v44 = vpop.f32.mrf.mxu0 }
 0x9fe   : > { %v1246_v45 = vadd.f32 %v1240_v44, %v1087_v25  ;;  %v437_v44 = vld [vmem:[%s2376_s13 + $0x8] sm:$0x3] }
 0x9ff   : > { %v1800_v46 = vpop.f32.mrf.mxu0 }
 0xa00   : > { %v1251_v47 = vadd.f32 %v1250_v43, %v1246_v45  ;;  %v1433_v45 = vrot.slane %v437_v44, %v441_v13 }
 0xa01   : > { %v1243_v48 = vpop.f32.mrf.mxu0 }
 0xa02   : > { %v1252_v49 = vadd.f32 %v1251_v47, %v2389_v4  ;;  %v1438_v47 = vrot.slane %v437_v44, %v501_v11 }
 0xa03   : > { %v1801_v50 = vpop.f32.mrf.mxu0 }
 0xa04   : > { %v1253_v51 = vsel %vm455_vm2, %v1252_v49, 0.0 }
 0xa05   : > { %1254 = vadd.xlane.f32.xlu1 %v1253_v51 }
 0xa8e   : > { %v1255_v52 = vpop.xlane.xlu1 %1254 }
 0xa8f   : > { %v1257_v53 = vmul.f32 0.03125, %v1255_v52 }
 0xa91   : > { %v1258_v54 = vsub.f32 %v1252_v49, %v1257_v53 }
 0xa93   : > { %v1259_v55 = vmul.f32 %v1258_v54, %v1258_v54 }
 0xa95   : > { %v1260_v56 = vsel %vm455_vm2, %v1259_v55, 0.0 }
 0xa96   : > { %1261 = vadd.xlane.f32.xlu0 %v1260_v56 }
 0xb1f   : > { %v1262_v60 = vpop.xlane.xlu0 %1261 }
 0xb20   : > { %v1263_v4 = vmul.f32 0.03125, %v1262_v60 }
 0xb22   : > { %v1264_v61 = vadd.f32 1e-05, %v1263_v4 }
 0xb24   : > { %1965 = vrsqrt.f32 %v1264_v61 }
 0xb31   : > { %v1966_v63 = vpop.eup %1965 }
 0xb32   : > { %v1266_v0 = vmul.f32 %v1966_v63, %v1258_v54 }
 0xb34   : > { %v1271_v3 = vmul.f32 %v1270_v27, %v1266_v0 }
 0xb36   : > { %v1276_v5 = vadd.f32 %v1275_v1, %v1271_v3 }
 0xb38   : > { %v1277_v6 = vpack.c.bf16 %v1276_v5, %v1276_v5 }
 0xb3a   : > { %1807 = vmatmul.mubr.msk.bf16.vlgmr.msra.gmra.mxu1 %vm455_vm2, %v1277_v6 }
 0xbfa   : > { %v1331_v17 = vpop.f32.mrf.mxu1 }
 0xbfb   : > { %v1332_v18 = vadd.f32 %v1331_v17, %v1281_v16 }
 0xbfc   : > { %v1808_v19 = vpop.f32.mrf.mxu1 }
 0xbfd   : > { %v1339_v20 = vmul.f32 0.70710677, %v1332_v18  ;;  %v1337_v25 = vmul.f32 0.5, %v1332_v18 }
 0xbfe   : > { %v1334_v21 = vpop.f32.mrf.mxu1 }
 0xbff   : > { %1967 = verf.f32 %v1339_v20 }
 0xc00   : > { %v1809_v22 = vpop.f32.mrf.mxu1 }
 0xc0c   : > { %v1968_v24 = vpop.eup %1967 }
 0xc0d   : > { %v1341_v26 = vadd.f32 1.0, %v1968_v24 }
 0xc0f   : > { %v1342_v28 = vmul.f32 %v1341_v26, %v1337_v25 }
 0xc11   : > { %v1343_v29 = vpack.c.bf16 %v1342_v28, %v1342_v28 }
 0xc13   : > { %1819 = vmatmul.mubr.msk.bf16.vlgmr.msra.gmra.mxu0 %vm1372_vm5, %v1343_v29 }
 0xcd3   : > { %v1410_v31 = vpop.f32.mrf.mxu0 }
 0xcd4   : > { %v1411_v32 = vadd.f32 %v1410_v31, %v1347_v30 }
 0xcd5   : > { %v1820_v33 = vpop.f32.mrf.mxu0 }
 0xcd6   : > { %v1416_v34 = vadd.f32 %v1411_v32, %v1276_v5 }
 0xcd7   : > { %v1413_v57 = vpop.f32.mrf.mxu0 }
 0xcd8   : > { %v1417_v35 = vsel %vm455_vm2, %v1416_v34, 0.0 }
 0xcd9   : > { %1418 = vadd.xlane.f32.xlu0 %v1417_v35  ;;  %v1821_v36 = vpop.f32.mrf.mxu0 }
 0xd62   : > { %v1419_v37 = vpop.xlane.xlu0 %1418 }
 0xd63   : > { %v1420_v38 = vmul.f32 0.03125, %v1419_v37 }
 0xd65   : > { %v1421_v39 = vsub.f32 %v1416_v34, %v1420_v38 }
 0xd67   : > { %v1422_v40 = vmul.f32 %v1421_v39, %v1421_v39 }
 0xd69   : > { %v1423_v41 = vsel %vm455_vm2, %v1422_v40, 0.0 }
 0xd6a   : > { %1424 = vadd.xlane.f32.xlu0 %v1423_v41 }
 0xdf3   : > { %v1425_v14 = vpop.xlane.xlu0 %1424 }
 0xdf4   : > { %v1426_v42 = vmul.f32 0.03125, %v1425_v14 }
 0xdf6   : > { %v1427_v43 = vadd.f32 1e-05, %v1426_v42 }
 0xdf8   : > { %1969 = vrsqrt.f32 %v1427_v43 }
 0xe05   : > { %v1970_v46 = vpop.eup %1969 }
 0xe06   : > { %v1429_v48 = vmul.f32 %v1970_v46, %v1421_v39 }
 0xe08   : > { %v1434_v49 = vmul.f32 %v1433_v45, %v1429_v48 }
 0xe0a   : > { %v1439_v50 = vadd.f32 %v1438_v47, %v1434_v49 }
 0xe0c   : > { %1440 = vst.msk [vmem:[%s2378_s17] sm:$0xff] %vm455_vm2, %v1439_v50 }
 0xe0d   : > { %2040 = shalt.err (!%p2037_p11)
}
 0xe0e   : > { %s2041_s11 = scalar_lea.hbm %s1453_s9, 128  ;;  %s2045_s29 = scalar_lea.hbm %s2623_s6, 256 }
 0xe0f   : > { %p2042_p13 = scmp.ne.s32.totalorder %s1453_s9, %s2041_s11  ;;  %p2046_p5 = scmp.lt.s32.totalorder %s1453_s9, %s2623_s6 }
 0xe10   : > { %p2047_p8 = scmp.lt.s32.totalorder %s2045_s29, %s2041_s11 }
 0xe11   : > { %p2043_p0 = pnand %p2042_p13, %p2286_p12 }
 0xe12   : > { %p2048_p1 = por %p2047_p8, %p2046_p5 }
 0xe13   : > { %p2044_p4 = pneg %p2043_p0 }
 0xe15   : > { %p2049_p6 = pnand %p2048_p1, %p2044_p4 }
 0xe17   : > { %2052 = shalt.err (!%p2049_p6)
}
 0xe18   : > { %1827 = dma.vmem_to_hbm [thread:$0]  (%p2286_p12), %s1456_s26, 128, %s1453_s9, %s1442_s18  }
 0xe19 PF: > { %p1841_p7 = scmp.ge.s32.totalorder %s2151_s7, 2  ;;  %s1467_s17 = sand.u32 1, %s2111_s21  }
 0xe1a   : > { %s1468_s3 = scalar_lea.sflag [#allocation4], %s1467_s17 }
 0xe1b   : > { %p1837_p9 = pnand %p1841_p7, %p2296_p2 }
 0xe1d   : > { %p1838_p3 = pneg %p1837_p9 }
 0xe1f   : > { %2106 = dma.done.wait (%p1838_p3), %s1468_s3, 128  }
 0xe20   : > { %2108 = vsyncadd (%p1838_p3), %s1468_s3, 4294967168  ;;  %s25_s7 = sadd.s32 1, %s2151_s7   ;;  %s2657_s25 = sld [smem:[#allocation11_spill]] }
 0xe21   : > { %p22_p10 = scmp.ge.s32.totalorder %s25_s7, 6   ;;  %s2658_s23 = sld [smem:[#allocation19_spill]] }
 0xe22   : > { %s2659_s24 = sld [smem:[#allocation12_spill]]  ;;  %s2666_s21 = smov %s2115_s22 }
 0xe23   : > { %s2660_s20 = sld [smem:[#allocation13_spill]] }
 0xe24   : > { %s2661_s26 = sld [smem:[#allocation18_spill]] }
 0xe25   : > { %s2662_s27 = sld [smem:[#allocation14_spill]]  ;;  %24 = sbr.rel (!%p22_p10) target bundleno = 14 (0xe), region = 118 }
 0xe26   : > { %s2663_s28 = sld [smem:[#allocation15_spill]]  ;;  %s2667_s22 = smov %s2657_s25 }
 0xe27   : > { %s2664_s29 = sld [smem:[#allocation16_spill]] }
 0xe28   : > { %s2665_s30 = sld [smem:[#allocation17_spill]] }
 0xe29   : > { %s2668_s25 = smov %s2660_s20 }
 0xe2a   :  { %1473 = vsyncpa [#allocation3], 1 }
 0xe2b   :  { %1475 = vsyncpa [#allocation3 + $0x1], 1 }
 0xe2c   :  { %1476 = vsyncpa [#allocation6], 1 }
 0xe2d   :  { %1478 = vsyncpa [#allocation6 + $0x1], 1 }
 0xe2e   :  { %1479 = vsyncpa [#allocation4], 1 }
 0xe2f   :  { %1481 = vsyncpa [#allocation4 + $0x1], 1 }

</bundles_post_ra>
